<compile_context>
chip_gen: v5e
topology: v5e:2x2
jax: 0.10.0
libtpu: 0.0.40
codegen_flags: <defaults>
</compile_context>

<pallas_src>
from functools import partial

import jax
import jax.numpy as jnp
from jax.experimental import pallas as pl
from jax.experimental.pallas import tpu as pltpu


def conv1x1_kernel(w_ref, x_ref, o_ref):
    # w_ref: (cout_tile, Cin) bf16 weight tile.
    # x_ref: (Cin, HW) activation slab (f32 in HBM; cast to bf16 for the MXU).
    # o_ref: (cout_tile, HW) f32 output tile.
    o_ref[...] = jnp.dot(
        w_ref[...].astype(jnp.bfloat16),
        x_ref[...].astype(jnp.bfloat16),
        preferred_element_type=jnp.float32,
    ).astype(o_ref.dtype)


def prepare_weight(weight_oihw):
    """One-time weight prep: OIHW f32 [Cout, Cin, 1, 1] -> bf16 [Cout, Cin]."""
    cout, cin = weight_oihw.shape[0], weight_oihw.shape[1]
    return weight_oihw.reshape(cout, cin).astype(jnp.bfloat16)


@partial(jax.jit, static_argnames=("cout_tile",))
def conv2d_1x1(x_nchw, w_mat, cout_tile=None):
    """x_nchw: [N, Cin, H, W] f32; w_mat: [Cout, Cin] (bf16); -> [N, Cout, H, W] f32."""
    N, Cin, H, W = x_nchw.shape
    Cout = w_mat.shape[0]
    HW = H * W

    if cout_tile is None:
        cout_tile = Cout                     # single whole-Cout block (v5e/v6e)
    nc = pl.cdiv(Cout, cout_tile)            # >1 only when splitting for v7x's 2 TCs

    # Free views only (no data movement): NCHW -> (N, Cin, H*W); weight already 2-D.
    x_mat = x_nchw.reshape(N, Cin, HW)

    out = pl.pallas_call(
        conv1x1_kernel,
        out_shape=jax.ShapeDtypeStruct((N, Cout, HW), x_nchw.dtype),
        grid=(N, nc),
        in_specs=[
            # Weight tile: rows split across the Cout grid axis (ragged last
            # block is fine: 232 = 128 + 104 when cout_tile=128).
            pl.BlockSpec((cout_tile, Cin), lambda n, c: (c, 0)),
            # One batch slab of X (batch dim squeezed), same for every Cout tile.
            pl.BlockSpec((None, Cin, HW), lambda n, c: (n, 0, 0)),
        ],
        out_specs=pl.BlockSpec((None, cout_tile, HW), lambda n, c: (n, c, 0)),
        compiler_params=pltpu.CompilerParams(
            # Both axes are independent -> shard across TensorCores where available.
            dimension_semantics=("parallel", "parallel"),
        ),
    )(w_mat, x_mat)

    # Free view back to NCHW.
    return out.reshape(N, Cout, H, W)


def _default_cout_tile(cout):
    """Split Cout across v7x's two TensorCores; keep one block elsewhere."""
    try:
        kind = jax.devices()[0].device_kind.lower()
    except Exception:
        kind = ""
    if "v7" in kind:
        return 128
    return cout  # == single block


if __name__ == "__main__":
    key = jax.random.PRNGKey(0)
    kx, kw = jax.random.split(key)

    # Shapes implied by the module: Conv2d(1392, 232, 1x1) applied to [1, 1392, 7, 7].
    Cin, Cout, H, W = 1392, 232, 7, 7
    x = jax.random.normal(kx, (1, Cin, H, W), dtype=jnp.float32)
    w = jax.random.normal(kw, (Cout, Cin, 1, 1), dtype=jnp.float32) * (1.0 / jnp.sqrt(Cin))

    # One-time weight conversion (analogous to loading bf16 weights).
    w_bf16 = prepare_weight(w)

    out = jax.block_until_ready(
        conv2d_1x1(x, w_bf16, cout_tile=_default_cout_tile(Cout))
    )
    assert out.shape == (1, Cout, H, W), out.shape

    # Reference 1: same numerics as the kernel (bf16-rounded inputs, f32 accumulate).
    ref_bf16 = jnp.einsum(
        "nchw,oc->nohw",
        x.astype(jnp.bfloat16).astype(jnp.float32),
        w_bf16.astype(jnp.float32),
    )
    assert jnp.allclose(out, ref_bf16, atol=1e-2, rtol=1e-2), "mismatch vs bf16 reference"

    # Reference 2: full-f32 conv (module semantics), loose tolerance for bf16 inputs.
    ref_f32 = jnp.einsum("nchw,oc->nohw", x, w.reshape(Cout, Cin))
    assert jnp.allclose(out, ref_f32, atol=6e-2, rtol=6e-2), "mismatch vs f32 reference"

    print("KERNEL_OK")
</pallas_src>

<mosaic_0001>
module attributes {stable_mosaic.version = 11 : i64} {
  func.func @conv1x1_kernel(%arg0: i32, %arg1: i32, %arg2: memref<232x1392xbf16, #tpu.memory_space<vmem>>, %arg3: memref<1x1392x49xf32, #tpu.memory_space<vmem>>, %arg4: memref<1x232x49xf32, #tpu.memory_space<vmem>>) attributes {dimension_semantics = [#tpu.dimension_semantics<parallel>, #tpu.dimension_semantics<parallel>], iteration_bounds = array<i64: 1, 1>, scalar_prefetch = 0 : i64, scratch_operands = 0 : i64, tpu.core_type = #tpu.core_type<tc>, window_params = [{transform_indices = @transform_0, window_bounds = array<i64: 232, 1392>}, {transform_indices = @transform_1, window_bounds = array<i64: 1, 1392, 49>}, {transform_indices = @transform_2, window_bounds = array<i64: 1, 232, 49>}]} {
    %c0 = arith.constant 0 : index
    %c0_0 = arith.constant 0 : index
    %0 = vector.load %arg2[%c0, %c0_0] : memref<232x1392xbf16, #tpu.memory_space<vmem>>, vector<232x1392xbf16>
    %c0_1 = arith.constant 0 : index
    %c0_2 = arith.constant 0 : index
    %c0_3 = arith.constant 0 : index
    %1 = vector.load %arg3[%c0_1, %c0_2, %c0_3] : memref<1x1392x49xf32, #tpu.memory_space<vmem>>, vector<1x1392x49xf32>
    %2 = vector.shape_cast %1 : vector<1x1392x49xf32> to vector<1392x49xf32>
    %3 = arith.truncf %2 : vector<1392x49xf32> to vector<1392x49xbf16>
    %cst = arith.constant dense<0.000000e+00> : vector<232x49xf32>
    %4 = tpu.matmul %0, %3, %cst {dimension_numbers = #tpu.dot_dimension_numbers<[1], [0], [0], [1], [0, 0, 1, 1], [], []>} : vector<232x1392xbf16>, vector<1392x49xbf16>, vector<232x49xf32> -> vector<232x49xf32>
    %c0_4 = arith.constant 0 : index
    %c0_5 = arith.constant 0 : index
    %c0_6 = arith.constant 0 : index
    %5 = vector.load %arg4[%c0_4, %c0_5, %c0_6] : memref<1x232x49xf32, #tpu.memory_space<vmem>>, vector<1x232x49xf32>
    %6 = vector.shape_cast %5 : vector<1x232x49xf32> to vector<232x49xf32>
    %7 = vector.shape_cast %4 : vector<232x49xf32> to vector<1x232x49xf32>
    tpu.vector_store %arg4[%c0_4, %c0_5, %c0_6], %7 {strides = array<i32>} : memref<1x232x49xf32, #tpu.memory_space<vmem>>, vector<1x232x49xf32>,
    return
  }
  func.func @transform_0(%arg0: i32, %arg1: i32) -> (i32, i32) {
    %c0_i32 = arith.constant 0 : i32
    %c0_i32_0 = arith.constant 0 : i32
    return %arg1, %c0_i32 : i32, i32
  }
  func.func @transform_1(%arg0: i32, %arg1: i32) -> (i32, i32, i32) {
    %c0_i32 = arith.constant 0 : i32
    %c0_i32_0 = arith.constant 0 : i32
    %c0_i32_1 = arith.constant 0 : i32
    return %arg0, %c0_i32, %c0_i32_0 : i32, i32, i32
  }
  func.func @transform_2(%arg0: i32, %arg1: i32) -> (i32, i32, i32) {
    %c0_i32 = arith.constant 0 : i32
    %c0_i32_0 = arith.constant 0 : i32
    return %arg0, %arg1, %c0_i32 : i32, i32, i32
  }
}

</mosaic_0001>

<bundles_post_ra>
// kernel: conv2d_1x1.1
= control target key start
LH: loop header
LB: loop body
LE: loop exit
PB: predicated region body
PF: predicated region fallthrough
CT: control target
= control target key end

     0   :  { %vm1255_vm0 = vcmask 916480   ;;  %vm2214_vm1 = vcmask 400384   ;;  %s5082_s1 = inlined_call_operand.vmem [shape: f32[1,1392,49], index: 1, kind: input, shape index: {}]   ;;  %s5083_s0 = inlined_call_operand.vmem [shape: bf16[232,1392], index: 0, kind: input, shape index: {}]   ;;  %s5084_s2 = inlined_call_operand.vmem [shape: f32[1,232,49], index: 2, kind: output, shape index: {}]  }
   0x1   :  { %v200_v0 = vld [vmem:[%s5082_s1 + $0x70] sm:$0xff]  ;;  %v201_v1 = vld [vmem:[%s5082_s1 + $0x78] sm:$0xff]  ;;  %v198_v9 = vld [vmem:[%s5082_s1 + $0x60] sm:$0xff] }
   0x2   :  { %v216_v2 = vld [vmem:[%s5082_s1 + $0xf0] sm:$0xff]  ;;  %v367_v3 = vpack.c.bf16 %v201_v1, %v200_v0  ;;  %v217_v4 = vld [vmem:[%s5082_s1 + $0xf8] sm:$0xff]  ;;  %v199_v10 = vld [vmem:[%s5082_s1 + $0x68] sm:$0xff] }
   0x3   :  { %v232_v5 = vld [vmem:[%s5082_s1 + $0x170] sm:$0xff]  ;;  %v233_v6 = vld [vmem:[%s5082_s1 + $0x178] sm:$0xff]  ;;  %v3091_v7 = vpack.c.bf16 %v217_v4, %v216_v2  ;;  %v214_v11 = vld [vmem:[%s5082_s1 + $0xe0] sm:$0xff]  ;;  %v366_v12 = vpack.c.bf16 %v199_v10, %v198_v9 }
   0x4   :  { %v3093_v8 = vpack.c.bf16 %v233_v6, %v232_v5  ;;  %1301 = vmatpush.bf16.msra.mxu0 %v367_v3  ;;  %3033 = vmatpush.bf16.msra.mxu3 %v367_v3  ;;  %v215_v13 = vld [vmem:[%s5082_s1 + $0xe8] sm:$0xff]  ;;  %v230_v14 = vld [vmem:[%s5082_s1 + $0x160] sm:$0xff]  ;;  %v196_v18 = vld [vmem:[%s5082_s1 + $0x50] sm:$0xff] }
   0x5   :  { %v231_v15 = vld [vmem:[%s5082_s1 + $0x168] sm:$0xff]  ;;  %1384 = vmatpush.bf16.msra.mxu1 %v3091_v7  ;;  %v3115_v16 = vpack.c.bf16 %v215_v13, %v214_v11  ;;  %v197_v19 = vld [vmem:[%s5082_s1 + $0x58] sm:$0xff]  ;;  %v212_v20 = vld [vmem:[%s5082_s1 + $0xd0] sm:$0xff] }
   0x6   :  { %1467 = vmatpush.bf16.msra.mxu2 %v3093_v8  ;;  %v3117_v17 = vpack.c.bf16 %v231_v15, %v230_v14  ;;  %v213_v21 = vld [vmem:[%s5082_s1 + $0xd8] sm:$0xff]  ;;  %v228_v22 = vld [vmem:[%s5082_s1 + $0x150] sm:$0xff]  ;;  %v365_v24 = vpack.c.bf16 %v197_v19, %v196_v18  ;;  %v194_v27 = vld [vmem:[%s5082_s1 + $0x40] sm:$0xff] }
   0x7   :  { %v229_v23 = vld [vmem:[%s5082_s1 + $0x158] sm:$0xff]  ;;  %v3139_v25 = vpack.c.bf16 %v213_v21, %v212_v20  ;;  %v195_v28 = vld [vmem:[%s5082_s1 + $0x48] sm:$0xff]  ;;  %v210_v29 = vld [vmem:[%s5082_s1 + $0xc0] sm:$0xff] }
   0x8   :  { %1302 = vmatpush.bf16.msra.mxu0 %v366_v12  ;;  %3034 = vmatpush.bf16.msra.mxu3 %v366_v12  ;;  %v3141_v26 = vpack.c.bf16 %v229_v23, %v228_v22  ;;  %v211_v30 = vld [vmem:[%s5082_s1 + $0xc8] sm:$0xff]  ;;  %v226_v31 = vld [vmem:[%s5082_s1 + $0x140] sm:$0xff]  ;;  %v364_v33 = vpack.c.bf16 %v195_v28, %v194_v27  ;;  %v192_v36 = vld [vmem:[%s5082_s1 + $0x30] sm:$0xff] }
   0x9   :  { %1385 = vmatpush.bf16.msra.mxu1 %v3115_v16  ;;  %v227_v32 = vld [vmem:[%s5082_s1 + $0x148] sm:$0xff]  ;;  %v3163_v34 = vpack.c.bf16 %v211_v30, %v210_v29  ;;  %v193_v37 = vld [vmem:[%s5082_s1 + $0x38] sm:$0xff]  ;;  %v208_v38 = vld [vmem:[%s5082_s1 + $0xb0] sm:$0xff] }
   0xa   :  { %1468 = vmatpush.bf16.msra.mxu2 %v3117_v17  ;;  %v3165_v35 = vpack.c.bf16 %v227_v32, %v226_v31  ;;  %v209_v39 = vld [vmem:[%s5082_s1 + $0xb8] sm:$0xff]  ;;  %v224_v40 = vld [vmem:[%s5082_s1 + $0x130] sm:$0xff]  ;;  %v363_v42 = vpack.c.bf16 %v193_v37, %v192_v36  ;;  %v190_v45 = vld [vmem:[%s5082_s1 + $0x20] sm:$0xff] }
   0xb   :  { %v225_v41 = vld [vmem:[%s5082_s1 + $0x138] sm:$0xff]  ;;  %v3187_v43 = vpack.c.bf16 %v209_v39, %v208_v38  ;;  %v191_v46 = vld [vmem:[%s5082_s1 + $0x28] sm:$0xff]  ;;  %v206_v47 = vld [vmem:[%s5082_s1 + $0xa0] sm:$0xff] }
   0xc   :  { %1303 = vmatpush.bf16.msra.mxu0 %v365_v24  ;;  %3035 = vmatpush.bf16.msra.mxu3 %v365_v24  ;;  %v3189_v44 = vpack.c.bf16 %v225_v41, %v224_v40  ;;  %v207_v48 = vld [vmem:[%s5082_s1 + $0xa8] sm:$0xff]  ;;  %v222_v49 = vld [vmem:[%s5082_s1 + $0x120] sm:$0xff]  ;;  %v362_v51 = vpack.c.bf16 %v191_v46, %v190_v45  ;;  %v188_v54 = vld [vmem:[%s5082_s1 + $0x10] sm:$0xff] }
   0xd   :  { %1386 = vmatpush.bf16.msra.mxu1 %v3139_v25  ;;  %v223_v50 = vld [vmem:[%s5082_s1 + $0x128] sm:$0xff]  ;;  %v3211_v52 = vpack.c.bf16 %v207_v48, %v206_v47  ;;  %v189_v55 = vld [vmem:[%s5082_s1 + $0x18] sm:$0xff]  ;;  %v204_v56 = vld [vmem:[%s5082_s1 + $0x90] sm:$0xff] }
   0xe   :  { %1469 = vmatpush.bf16.msra.mxu2 %v3141_v26  ;;  %v3213_v53 = vpack.c.bf16 %v223_v50, %v222_v49  ;;  %v205_v57 = vld [vmem:[%s5082_s1 + $0x98] sm:$0xff]  ;;  %v220_v58 = vld [vmem:[%s5082_s1 + $0x110] sm:$0xff]  ;;  %v361_v60 = vpack.c.bf16 %v189_v55, %v188_v54  ;;  %v186_v61 = vld [vmem:[%s5082_s1] sm:$0xff] }
   0xf   :  { %v221_v59 = vld [vmem:[%s5082_s1 + $0x118] sm:$0xff]  ;;  %v187_v62 = vld [vmem:[%s5082_s1 + $0x8] sm:$0xff]  ;;  %v202_v63 = vld [vmem:[%s5082_s1 + $0x80] sm:$0xff]  ;;  %v3244_v0 = vpack.c.bf16 %v205_v57, %v204_v56 }
  0x10   :  { %1304 = vmatpush.bf16.msra.mxu0 %v364_v33  ;;  %3036 = vmatpush.bf16.msra.mxu3 %v364_v33  ;;  %v3246_v1 = vpack.c.bf16 %v221_v59, %v220_v58  ;;  %v203_v2 = vld [vmem:[%s5082_s1 + $0x88] sm:$0xff]  ;;  %v218_v3 = vld [vmem:[%s5082_s1 + $0x100] sm:$0xff]  ;;  %v296_v9 = vld [vmem:[%s5082_s1 + $0x370] sm:$0xff]  ;;  %v360_v13 = vpack.c.bf16 %v187_v62, %v186_v61 }
  0x11   :  { %1387 = vmatpush.bf16.msra.mxu1 %v3163_v34  ;;  %v219_v4 = vld [vmem:[%s5082_s1 + $0x108] sm:$0xff]  ;;  %v2250_v5 = vld [vmem:[%s5083_s0] sm:$0xf]  ;;  %v297_v10 = vld [vmem:[%s5082_s1 + $0x378] sm:$0xff]  ;;  %v3286_v19 = vpack.c.bf16 %v203_v2, %v202_v63 }
  0x12   :  { %1470 = vmatpush.bf16.msra.mxu2 %v3165_v35  ;;  %v2884_v6 = vld [vmem:[%s5083_s0 + $0x28] sm:$0xf0]  ;;  %v264_v11 = vld [vmem:[%s5082_s1 + $0x270] sm:$0xff]  ;;  %v265_v12 = vld [vmem:[%s5082_s1 + $0x278] sm:$0xff]  ;;  %v3288_v20 = vpack.c.bf16 %v219_v4, %v218_v3  ;;  %v415_v24 = vpack.c.bf16 %v297_v10, %v296_v9 }
  0x13   :  { %v2778_v14 = vld [vmem:[%s5083_s0 + $0x420] sm:$0xf]  ;;  %v3016_v15 = vld [vmem:[%s5083_s0 + $0x448] sm:$0xf0]  ;;  %v2879_v18 = vld [vmem:[%s5083_s0 + $0x4] sm:$0xf]  ;;  %v399_v27 = vpack.c.bf16 %v265_v12, %v264_v11  ;;  %v2251_v31 = vor.u32 %v2884_v6, %v2250_v5 }
  0x14   :  { %1305 = vmatpush.bf16.msra.mxu0 %v363_v42  ;;  %3037 = vmatpush.bf16.msra.mxu3 %v363_v42  ;;  %v2252_v21 = vld [vmem:[%s5083_s0 + $0x2c] sm:$0xf0]  ;;  %v2258_v22 = vld [vmem:[%s5083_s0 + $0x8] sm:$0xf]  ;;  %v2885_v23 = vld [vmem:[%s5083_s0 + $0x30] sm:$0xf0]  ;;  %v2779_v32 = vor.u32 %v3016_v15, %v2778_v14 }
  0x15   :  { %1388 = vmatpush.bf16.msra.mxu1 %v3187_v43  ;;  %v280_v28 = vld [vmem:[%s5082_s1 + $0x2f0] sm:$0xff]  ;;  %v281_v29 = vld [vmem:[%s5082_s1 + $0x2f8] sm:$0xff]  ;;  %v294_v30 = vld [vmem:[%s5082_s1 + $0x360] sm:$0xff]  ;;  %v2255_v38 = vor.u32 %v2879_v18, %v2252_v21  ;;  %v2259_v39 = vor.u32 %v2885_v23, %v2258_v22 }
  0x16   :  { %1471 = vmatpush.bf16.msra.mxu2 %v3189_v44  ;;  %v295_v33 = vld [vmem:[%s5082_s1 + $0x368] sm:$0xff]  ;;  %v262_v36 = vld [vmem:[%s5082_s1 + $0x260] sm:$0xff]  ;;  %v407_v40 = vpack.c.bf16 %v281_v29, %v280_v28  ;;  %v2294_v48 = vld [vmem:[%s5083_s0 + $0x58] sm:$0xf] }
  0x17   :  { %v263_v37 = vld [vmem:[%s5082_s1 + $0x268] sm:$0xff]  ;;  %v414_v41 = vpack.c.bf16 %v295_v33, %v294_v30  ;;  %v278_v45 = vld [vmem:[%s5082_s1 + $0x2e0] sm:$0xff]  ;;  %v2822_v50 = vld [vmem:[%s5083_s0 + $0x478] sm:$0xf] }
  0x18   :  { %1306 = vmatpush.bf16.msra.mxu0 %v362_v51  ;;  %3038 = vmatpush.bf16.msra.mxu3 %v362_v51  ;;  %v398_v42 = vpack.c.bf16 %v263_v37, %v262_v36  ;;  %v279_v46 = vld [vmem:[%s5082_s1 + $0x2e8] sm:$0xff]  ;;  %v2895_v49 = vld [vmem:[%s5083_s0 + $0x80] sm:$0xf0]  ;;  %v2302_v54 = vld [vmem:[%s5083_s0 + $0x60] sm:$0xf] }
  0x19   :  { %1389 = vmatpush.bf16.msra.mxu1 %v3211_v52  ;;  %v406_v47 = vpack.c.bf16 %v279_v46, %v278_v45  ;;  %v2296_v51 = vld [vmem:[%s5083_s0 + $0x84] sm:$0xf0]  ;;  %v2896_v55 = vld [vmem:[%s5083_s0 + $0x88] sm:$0xf0]  ;;  %v2295_v56 = vor.u32 %v2895_v49, %v2294_v48  ;;  %v293_v61 = vld [vmem:[%s5082_s1 + $0x358] sm:$0xff] }
  0x1a   :  { %1472 = vmatpush.bf16.msra.mxu2 %v3213_v53  ;;  %v2303_v59 = vor.u32 %v2896_v55, %v2302_v54  ;;  %v276_v63 = vld [vmem:[%s5082_s1 + $0x2d0] sm:$0xff]  ;;  %v277_v2 = vld [vmem:[%s5082_s1 + $0x2d8] sm:$0xff]  ;;  %v2340_v11 = vld [vmem:[%s5083_s0 + $0xdc] sm:$0xf0] }
  0x1b   :  { %v405_v4 = vpack.c.bf16 %v277_v2, %v276_v63  ;;  %v2338_v6 = vld [vmem:[%s5083_s0 + $0xb0] sm:$0xf]  ;;  %v2906_v9 = vld [vmem:[%s5083_s0 + $0xd8] sm:$0xf0]  ;;  %v2901_v10 = vld [vmem:[%s5083_s0 + $0xb4] sm:$0xf] }
  0x1c   :  { %1307 = vmatpush.bf16.msra.mxu0 %v361_v60  ;;  %3039 = vmatpush.bf16.msra.mxu3 %v361_v60  ;;  %v292_v60 = vld [vmem:[%s5082_s1 + $0x350] sm:$0xff]  ;;  %v2907_v12 = vld [vmem:[%s5083_s0 + $0xe0] sm:$0xf0]  ;;  %v2343_v15 = vor.u32 %v2901_v10, %v2340_v11  ;;  %v2382_v29 = vld [vmem:[%s5083_s0 + $0x108] sm:$0xf] }
  0x1d   :  { %1390 = vmatpush.bf16.msra.mxu1 %v3244_v0  ;;  %v413_v62 = vpack.c.bf16 %v293_v61, %v292_v60  ;;  %v290_v21 = vld [vmem:[%s5082_s1 + $0x340] sm:$0xff]  ;;  %v2917_v30 = vld [vmem:[%s5083_s0 + $0x130] sm:$0xf0]  ;;  %v2390_v33 = vld [vmem:[%s5083_s0 + $0x110] sm:$0xf] }
  0x1e   :  { %1473 = vmatpush.bf16.msra.mxu2 %v3246_v1  ;;  %v258_v22 = vld [vmem:[%s5082_s1 + $0x240] sm:$0xff]  ;;  %v2918_v36 = vld [vmem:[%s5083_s0 + $0x138] sm:$0xf0]  ;;  %v2383_v37 = vor.u32 %v2917_v30, %v2382_v29  ;;  %v2434_v45 = vld [vmem:[%s5083_s0 + $0x168] sm:$0xf] }
  0x1f   :  { %v2929_v46 = vld [vmem:[%s5083_s0 + $0x190] sm:$0xf0]  ;;  %v257_v54 = vld [vmem:[%s5082_s1 + $0x238] sm:$0xff]  ;;  %v2939_v61 = vld [vmem:[%s5083_s0 + $0x1e0] sm:$0xf0] }
  0x20   :  { %1308 = vmatpush.bf16.msra.mxu0 %v360_v13  ;;  %3040 = vmatpush.bf16.msra.mxu3 %v360_v13  ;;  %v2339_v13 = vor.u32 %v2906_v9, %v2338_v6  ;;  %v272_v55 = vld [vmem:[%s5082_s1 + $0x2b0] sm:$0xff]  ;;  %v2470_v60 = vld [vmem:[%s5083_s0 + $0x1b8] sm:$0xf]  ;;  %v2940_v63 = vld [vmem:[%s5083_s0 + $0x1e8] sm:$0xf0] }
  0x21   :  { %1391 = vmatpush.bf16.msra.mxu1 %v3286_v19  ;;  %v2471_v2 = vor.u32 %v2939_v61, %v2470_v60  ;;  %v249_v6 = vld [vmem:[%s5082_s1 + $0x1f8] sm:$0xff]  ;;  %v246_v10 = vld [vmem:[%s5082_s1 + $0x1e0] sm:$0xff]  ;;  %v247_v11 = vld [vmem:[%s5082_s1 + $0x1e8] sm:$0xff] }
  0x22   :  { %1474 = vmatpush.bf16.msra.mxu2 %v3288_v20  ;;  %v242_v29 = vld [vmem:[%s5082_s1 + $0x1c0] sm:$0xff]  ;;  %v243_v30 = vld [vmem:[%s5082_s1 + $0x1c8] sm:$0xff] }
  0x23   :  { %1309 = vmatmul.bf16.vlgmr.msra.gmra.mxu0 %v2251_v31  ;;  %1369 = vmatmul.bf16.vlgmr.msra.gmra.mxu3 %v2779_v32  ;;  %v2912_v31 = vld [vmem:[%s5083_s0 + $0x10c] sm:$0xf]  ;;  %v2384_v32 = vld [vmem:[%s5083_s0 + $0x134] sm:$0xf0] }
  0x24   :  { %1633 = vmatpush.bf16.msrb.mxu0 %v399_v27  ;;  %1392 = vmatmul.bf16.vlgmr.msra.gmra.mxu1 %v2255_v38 }
  0x25   :  { %1475 = vmatmul.bf16.vlgmr.msra.gmra.mxu2 %v2259_v39  ;;  %1716 = vmatpush.bf16.msrb.mxu1 %v407_v40  ;;  %v2387_v39 = vor.u32 %v2912_v31, %v2384_v32  ;;  %v2391_v40 = vor.u32 %v2918_v36, %v2390_v33  ;;  %v254_v36 = vld [vmem:[%s5082_s1 + $0x220] sm:$0xff] }
  0x26   :  { %1799 = vmatpush.bf16.msrb.mxu2 %v415_v24  ;;  %3041 = vmatpush.bf16.msrb.mxu3 %v3091_v7  ;;  %v3027_v7 = vld [vmem:[%s5083_s0 + $0x4a0] sm:$0xf0]  ;;  %v275_v24 = vld [vmem:[%s5082_s1 + $0x2c8] sm:$0xff] }
  0x27   :  { %v2823_v57 = vor.u32 %v3027_v7, %v2822_v50  ;;  %v2435_v50 = vor.u32 %v2929_v46, %v2434_v45  ;;  %v288_v7 = vld [vmem:[%s5082_s1 + $0x330] sm:$0xff] }
  0x28   :  { %1634 = vmatpush.bf16.msrb.mxu0 %v398_v42  ;;  %v3022_v42 = vld [vmem:[%s5083_s0 + $0x47c] sm:$0xf]  ;;  %v236_v46 = vld [vmem:[%s5082_s1 + $0x190] sm:$0xff] }
  0x29   :  { %1717 = vmatpush.bf16.msrb.mxu1 %v406_v47 }
  0x2a   :  { %1800 = vmatpush.bf16.msrb.mxu2 %v414_v41  ;;  %3042 = vmatpush.bf16.msrb.mxu3 %v3115_v16  ;;  %v2890_v16 = vld [vmem:[%s5083_s0 + $0x5c] sm:$0xf]  ;;  %v2426_v41 = vld [vmem:[%s5083_s0 + $0x160] sm:$0xf] }
  0x2b   :  { %v2299_v58 = vor.u32 %v2890_v16, %v2296_v51  ;;  %v289_v16 = vld [vmem:[%s5082_s1 + $0x338] sm:$0xff] }
  0x2c   :  { %v411_v51 = vpack.c.bf16 %v289_v16, %v288_v7  ;;  %v2956_v7 = vld [vmem:[%s5083_s0 + $0x26c] sm:$0xf]  ;;  %v2830_v16 = vld [vmem:[%s5083_s0 + $0x480] sm:$0xf] }
  0x2d   :  { %1718 = vmatpush.bf16.msrb.mxu1 %v405_v4 }
  0x2e   :  { %3043 = vmatpush.bf16.msrb.mxu3 %v3139_v25  ;;  %v260_v25 = vld [vmem:[%s5082_s1 + $0x250] sm:$0xff]  ;;  %1801 = vmatpush.bf16.msrb.mxu2 %v413_v62  ;;  %v2472_v62 = vld [vmem:[%s5083_s0 + $0x1e4] sm:$0xf0] }
  0x32   :  { %3044 = vmatpush.bf16.msrb.mxu3 %v3163_v34  ;;  %v261_v34 = vld [vmem:[%s5082_s1 + $0x258] sm:$0xff] }
  0x33   :  { %1314 = vmatmul.bf16.gmra.mxu0 %v2295_v56  ;;  %1374 = vmatmul.bf16.gmra.mxu3 %v2823_v57  ;;  %v397_v3 = vpack.c.bf16 %v261_v34, %v260_v25  ;;  %v273_v56 = vld [vmem:[%s5082_s1 + $0x2b8] sm:$0xff]  ;;  %v2478_v34 = vld [vmem:[%s5083_s0 + $0x1c0] sm:$0xf] }
  0x34   :  { %1397 = vmatmul.bf16.gmra.mxu1 %v2299_v58  ;;  %v403_v58 = vpack.c.bf16 %v273_v56, %v272_v55  ;;  %v2934_v25 = vld [vmem:[%s5083_s0 + $0x1bc] sm:$0xf]  ;;  %v234_v56 = vld [vmem:[%s5082_s1 + $0x180] sm:$0xff] }
  0x35   :  { %1480 = vmatmul.bf16.gmra.mxu2 %v2303_v59  ;;  %1635 = vmatpush.bf16.msrb.mxu0 %v397_v3  ;;  %v2475_v4 = vor.u32 %v2934_v25, %v2472_v62  ;;  %v2962_v55 = vld [vmem:[%s5083_s0 + $0x298] sm:$0xf0]  ;;  %v284_v62 = vld [vmem:[%s5082_s1 + $0x310] sm:$0xff] }
  0x36   :  { %3045 = vmatpush.bf16.msrb.mxu3 %v3187_v43  ;;  %v3375_v43 = vld [vmem:[%s5083_s0 + $0x4d0] sm:$0xff] }
  0x37   :  { %v929_v5 = vunpack.c.l.b16 %v3375_v43  ;;  %v930_v59 = vunpack.c.h.b16 %v3375_v43  ;;  %v2479_v43 = vor.u32 %v2940_v63, %v2478_v34  ;;  %v285_v34 = vld [vmem:[%s5082_s1 + $0x318] sm:$0xff] }
  0x38   :  { %v409_v63 = vpack.c.bf16 %v285_v34, %v284_v62  ;;  %v2994_v62 = vld [vmem:[%s5083_s0 + $0x398] sm:$0xf0]  ;;  %v2989_v34 = vld [vmem:[%s5083_s0 + $0x374] sm:$0xf] }
  0x39   :  { %v1094_v14 = vpack.c.b16 %v929_v5, %v929_v5  ;;  %v1095_v3 = vpack.c.b16 %v930_v59, %v930_v59  ;;  %v248_v5 = vld [vmem:[%s5082_s1 + $0x1f0] sm:$0xff] }
  0x3a   :  { %3046 = vmatpush.bf16.msrb.mxu3 %v3211_v52  ;;  %v2346_v52 = vld [vmem:[%s5083_s0 + $0xb8] sm:$0xf]  ;;  %v391_v9 = vpack.c.bf16 %v249_v6, %v248_v5 }
  0x3b   :  { %v2347_v18 = vor.u32 %v2907_v12, %v2346_v52  ;;  %v286_v52 = vld [vmem:[%s5082_s1 + $0x320] sm:$0xff]  ;;  %v287_v12 = vld [vmem:[%s5082_s1 + $0x328] sm:$0xff] }
  0x3e   :  { %3047 = vmatpush.bf16.msrb.mxu3 %v3244_v0  ;;  %v291_v0 = vld [vmem:[%s5082_s1 + $0x348] sm:$0xff] }
  0x3f   :  { %v412_v23 = vpack.c.bf16 %v291_v0, %v290_v21  ;;  %v2514_v0 = vld [vmem:[%s5083_s0 + $0x210] sm:$0xf] }
  0x41   :  { %1802 = vmatpush.bf16.msrb.mxu2 %v412_v23  ;;  %v2945_v23 = vld [vmem:[%s5083_s0 + $0x214] sm:$0xf] }
  0x42   :  { %3048 = vmatpush.bf16.msrb.mxu3 %v3286_v19  ;;  %v274_v19 = vld [vmem:[%s5082_s1 + $0x2c0] sm:$0xff] }
  0x43   :  { %1319 = vmatmul.bf16.gmra.mxu0 %v2339_v13  ;;  %1379 = vmatmul.bf16.gmra.mxu3 %v1094_v14  ;;  %v404_v28 = vpack.c.bf16 %v275_v24, %v274_v19  ;;  %v390_v13 = vpack.c.bf16 %v247_v11, %v246_v10  ;;  %v410_v14 = vpack.c.bf16 %v287_v12, %v286_v52  ;;  %v3017_v19 = vld [vmem:[%s5083_s0 + $0x450] sm:$0xf0]  ;;  %v2516_v24 = vld [vmem:[%s5083_s0 + $0x23c] sm:$0xf0]  ;;  %v2972_v11 = vld [vmem:[%s5083_s0 + $0x2e8] sm:$0xf0] }
  0x44   :  { %1402 = vmatmul.bf16.gmra.mxu1 %v2343_v15  ;;  %v244_v15 = vld [vmem:[%s5082_s1 + $0x1d0] sm:$0xff]  ;;  %v2519_v32 = vor.u32 %v2945_v23, %v2516_v24  ;;  %v2602_v10 = vld [vmem:[%s5083_s0 + $0x2c0] sm:$0xf]  ;;  %v2967_v52 = vld [vmem:[%s5083_s0 + $0x2c4] sm:$0xf] }
  0x45   :  { %1485 = vmatmul.bf16.gmra.mxu2 %v2347_v18  ;;  %1719 = vmatpush.bf16.msrb.mxu1 %v404_v28  ;;  %v245_v18 = vld [vmem:[%s5082_s1 + $0x1d8] sm:$0xff]  ;;  %v2951_v28 = vld [vmem:[%s5083_s0 + $0x240] sm:$0xf0] }
  0x46   :  { %3049 = vmatpush.bf16.msra.mxu3 %v3093_v8  ;;  %v259_v8 = vld [vmem:[%s5082_s1 + $0x248] sm:$0xff]  ;;  %1803 = vmatpush.bf16.msrb.mxu2 %v411_v51  ;;  %v389_v21 = vpack.c.bf16 %v245_v18, %v244_v15  ;;  %v2560_v51 = vld [vmem:[%s5083_s0 + $0x294] sm:$0xf0]  ;;  %v2973_v15 = vld [vmem:[%s5083_s0 + $0x2f0] sm:$0xf0]  ;;  %v2603_v18 = vor.u32 %v2972_v11, %v2602_v10 }
  0x47   :  { %v396_v27 = vpack.c.bf16 %v259_v8, %v258_v22  ;;  %v2950_v22 = vld [vmem:[%s5083_s0 + $0x238] sm:$0xf0]  ;;  %v2786_v8 = vld [vmem:[%s5083_s0 + $0x428] sm:$0xf]  ;;  %v2563_v60 = vor.u32 %v2956_v7, %v2560_v51  ;;  %v250_v7 = vld [vmem:[%s5082_s1 + $0x200] sm:$0xff] }
  0x48   :  { %v2515_v31 = vor.u32 %v2950_v22, %v2514_v0 }
  0x49   :  { %1636 = vmatpush.bf16.msrb.mxu0 %v396_v27  ;;  %1720 = vmatpush.bf16.msrb.mxu1 %v403_v58  ;;  %v2522_v27 = vld [vmem:[%s5083_s0 + $0x218] sm:$0xf] }
  0x4a   :  { %3050 = vmatpush.bf16.msra.mxu3 %v3117_v17  ;;  %v3011_v17 = vld [vmem:[%s5083_s0 + $0x424] sm:$0xf]  ;;  %1804 = vmatpush.bf16.msrb.mxu2 %v410_v14  ;;  %v2523_v33 = vor.u32 %v2951_v28, %v2522_v27  ;;  %v2610_v14 = vld [vmem:[%s5083_s0 + $0x2c8] sm:$0xf] }
  0x4b   :  { %v2611_v23 = vor.u32 %v2973_v15, %v2610_v14 }
  0x4e   :  { %3051 = vmatpush.bf16.msra.mxu3 %v3141_v26  ;;  %v2780_v26 = vld [vmem:[%s5083_s0 + $0x44c] sm:$0xf0]  ;;  %1805 = vmatpush.bf16.msrb.mxu2 %v409_v63  ;;  %v2891_v63 = vld [vmem:[%s5083_s0 + $0x64] sm:$0xf] }
  0x4f   :  { %v2783_v38 = vor.u32 %v3011_v17, %v2780_v26  ;;  %v2787_v17 = vor.u32 %v3017_v19, %v2786_v8  ;;  %v388_v26 = vpack.c.bf16 %v243_v30, %v242_v29 }
  0x52   :  { %3052 = vmatpush.bf16.msra.mxu3 %v3165_v35  ;;  %v2928_v35 = vld [vmem:[%s5083_s0 + $0x188] sm:$0xf0] }
  0x53   :  { %1324 = vmatmul.bf16.gmra.mxu0 %v2383_v37  ;;  %1452 = vmatmul.bf16.vlgmr.msrb.gmra.mxu3 %v2783_v38  ;;  %v2427_v47 = vor.u32 %v2928_v35, %v2426_v41  ;;  %v255_v37 = vld [vmem:[%s5082_s1 + $0x228] sm:$0xff]  ;;  %v270_v38 = vld [vmem:[%s5082_s1 + $0x2a0] sm:$0xff]  ;;  %v240_v35 = vld [vmem:[%s5082_s1 + $0x1b0] sm:$0xff] }
  0x54   :  { %1407 = vmatmul.bf16.gmra.mxu1 %v2387_v39  ;;  %v394_v39 = vpack.c.bf16 %v255_v37, %v254_v36  ;;  %v2978_v37 = vld [vmem:[%s5083_s0 + $0x31c] sm:$0xf] }
  0x55   :  { %1490 = vmatmul.bf16.gmra.mxu2 %v2391_v40  ;;  %v271_v40 = vld [vmem:[%s5082_s1 + $0x2a8] sm:$0xff] }
  0x56   :  { %3053 = vmatpush.bf16.msra.mxu3 %v3189_v44  ;;  %v2923_v44 = vld [vmem:[%s5083_s0 + $0x164] sm:$0xf]  ;;  %v402_v41 = vpack.c.bf16 %v271_v40, %v270_v38  ;;  %v2880_v38 = vld [vmem:[%s5083_s0 + $0xc] sm:$0xf]  ;;  %v2648_v40 = vld [vmem:[%s5083_s0 + $0x344] sm:$0xf0] }
  0x58   :  { %1721 = vmatpush.bf16.msrb.mxu1 %v402_v41  ;;  %v2654_v41 = vld [vmem:[%s5083_s0 + $0x320] sm:$0xf] }
  0x5a   :  { %3054 = vmatpush.bf16.msra.mxu3 %v3213_v53  ;;  %v2824_v53 = vld [vmem:[%s5083_s0 + $0x4a4] sm:$0xf0] }
  0x5b   :  { %v2827_v48 = vor.u32 %v3022_v42, %v2824_v53  ;;  %v238_v53 = vld [vmem:[%s5082_s1 + $0x1a0] sm:$0xff] }
  0x5e   :  { %3055 = vmatpush.bf16.msra.mxu3 %v3246_v1  ;;  %v2428_v1 = vld [vmem:[%s5083_s0 + $0x18c] sm:$0xf0] }
  0x5f   :  { %v2431_v49 = vor.u32 %v2923_v44, %v2428_v1  ;;  %v241_v44 = vld [vmem:[%s5082_s1 + $0x1b8] sm:$0xff]  ;;  %v239_v1 = vld [vmem:[%s5082_s1 + $0x1a8] sm:$0xff] }
  0x60   :  { %v387_v42 = vpack.c.bf16 %v241_v44, %v240_v35  ;;  %v386_v45 = vpack.c.bf16 %v239_v1, %v238_v53  ;;  %v2984_v35 = vld [vmem:[%s5083_s0 + $0x348] sm:$0xf0] }
  0x62   :  { %3056 = vmatpush.bf16.msra.mxu3 %v3288_v20  ;;  %v256_v20 = vld [vmem:[%s5082_s1 + $0x230] sm:$0xff] }
  0x63   :  { %1329 = vmatmul.bf16.gmra.mxu0 %v2427_v47  ;;  %1457 = vmatmul.bf16.gmra.mxu3 %v2827_v48  ;;  %v395_v57 = vpack.c.bf16 %v257_v54, %v256_v20  ;;  %v237_v47 = vld [vmem:[%s5082_s1 + $0x198] sm:$0xff]  ;;  %v2558_v48 = vld [vmem:[%s5083_s0 + $0x268] sm:$0xf]  ;;  %v3028_v20 = vld [vmem:[%s5083_s0 + $0x4a8] sm:$0xf0] }
  0x64   :  { %1412 = vmatmul.bf16.gmra.mxu1 %v2431_v49  ;;  %v2961_v49 = vld [vmem:[%s5083_s0 + $0x290] sm:$0xf0]  ;;  %v2566_v54 = vld [vmem:[%s5083_s0 + $0x270] sm:$0xf]  ;;  %v2831_v59 = vor.u32 %v3028_v20, %v2830_v16  ;;  %v251_v16 = vld [vmem:[%s5082_s1 + $0x208] sm:$0xff] }
  0x65   :  { %1495 = vmatmul.bf16.gmra.mxu2 %v2435_v50  ;;  %1637 = vmatpush.bf16.msrb.mxu0 %v395_v57  ;;  %v385_v50 = vpack.c.bf16 %v237_v47, %v236_v46  ;;  %v235_v57 = vld [vmem:[%s5082_s1 + $0x188] sm:$0xff]  ;;  %v2559_v58 = vor.u32 %v2961_v49, %v2558_v48  ;;  %v2567_v61 = vor.u32 %v2962_v55, %v2566_v54  ;;  %v266_v20 = vld [vmem:[%s5082_s1 + $0x280] sm:$0xff] }
  0x66   :  { %1550 = vmatpush.bf16.msrb.mxu3 %v391_v9  ;;  %v384_v25 = vpack.c.bf16 %v235_v57, %v234_v56  ;;  %v269_v9 = vld [vmem:[%s5082_s1 + $0x298] sm:$0xff]  ;;  %v2651_v47 = vor.u32 %v2978_v37, %v2648_v40  ;;  %v2655_v48 = vor.u32 %v2984_v35, %v2654_v41  ;;  %v392_v51 = vpack.c.bf16 %v251_v16, %v250_v7  ;;  %v267_v54 = vld [vmem:[%s5082_s1 + $0x288] sm:$0xff]  ;;  %v3005_v37 = vld [vmem:[%s5083_s0 + $0x3f0] sm:$0xf0] }
  0x67   :  { %v400_v55 = vpack.c.bf16 %v267_v54, %v266_v20  ;;  %v3000_v40 = vld [vmem:[%s5083_s0 + $0x3cc] sm:$0xf]  ;;  %v2902_v41 = vld [vmem:[%s5083_s0 + $0xbc] sm:$0xf]  ;;  %v2348_v35 = vld [vmem:[%s5083_s0 + $0xe4] sm:$0xf0] }
  0x69   :  { %1638 = vmatpush.bf16.msrb.mxu0 %v394_v39  ;;  %v2260_v39 = vld [vmem:[%s5083_s0 + $0x34] sm:$0xf0] }
  0x6a   :  { %1551 = vmatpush.bf16.msrb.mxu3 %v390_v13  ;;  %v2604_v13 = vld [vmem:[%s5083_s0 + $0x2ec] sm:$0xf0]  ;;  %v2263_v1 = vor.u32 %v2880_v38, %v2260_v39  ;;  %v345_v39 = vld [vmem:[%s5082_s1 + $0x4f8] sm:$0xff] }
  0x6b   :  { %v2607_v22 = vor.u32 %v2967_v52, %v2604_v13 }
  0x6e   :  { %1552 = vmatpush.bf16.msrb.mxu3 %v389_v21 }
  0x72   :  { %1553 = vmatpush.bf16.msrb.mxu3 %v388_v26  ;;  %v283_v26 = vld [vmem:[%s5082_s1 + $0x308] sm:$0xff] }
  0x73   :  { %1334 = vmatmul.bf16.gmra.mxu0 %v2471_v2  ;;  %1462 = vmatmul.bf16.gmra.mxu3 %v1095_v3  ;;  %v181_v2 = vld [vmem:[%s5083_s0 + $0x4d8] sm:$0xff]  ;;  %v252_v3 = vld [vmem:[%s5082_s1 + $0x210] sm:$0xff] }
  0x74   :  { %1417 = vmatmul.bf16.gmra.mxu1 %v2475_v4  ;;  %v253_v4 = vld [vmem:[%s5082_s1 + $0x218] sm:$0xff]  ;;  %v931_v5 = vunpack.c.l.b16 %v181_v2  ;;  %v2304_v2 = vld [vmem:[%s5083_s0 + $0x8c] sm:$0xf0] }
  0x75   :  { %1500 = vmatmul.bf16.gmra.mxu2 %v2479_v43  ;;  %v268_v43 = vld [vmem:[%s5082_s1 + $0x290] sm:$0xff]  ;;  %v393_v6 = vpack.c.bf16 %v253_v4, %v252_v3  ;;  %v2692_v3 = vld [vmem:[%s5083_s0 + $0x39c] sm:$0xf0]  ;;  %v2698_v4 = vld [vmem:[%s5083_s0 + $0x378] sm:$0xf]  ;;  %v2307_v10 = vor.u32 %v2891_v63, %v2304_v2 }
  0x76   :  { %1554 = vmatpush.bf16.msrb.mxu3 %v387_v42  ;;  %v401_v12 = vpack.c.bf16 %v269_v9, %v268_v43  ;;  %v1096_v21 = vpack.c.b16 %v931_v5, %v931_v5  ;;  %v2995_v43 = vld [vmem:[%s5083_s0 + $0x3a0] sm:$0xf0]  ;;  %v2913_v63 = vld [vmem:[%s5083_s0 + $0x114] sm:$0xf]  ;;  %v2392_v2 = vld [vmem:[%s5083_s0 + $0x13c] sm:$0xf0] }
  0x77   :  { %1639 = vmatpush.bf16.msrb.mxu0 %v393_v6  ;;  %v2699_v13 = vor.u32 %v2995_v43, %v2698_v4  ;;  %v2881_v4 = vld [vmem:[%s5083_s0 + $0x14] sm:$0xf]  ;;  %v2268_v43 = vld [vmem:[%s5083_s0 + $0x3c] sm:$0xf0] }
  0x78   :  { %1722 = vmatpush.bf16.msrb.mxu1 %v401_v12  ;;  %v2695_v12 = vor.u32 %v2989_v34, %v2692_v3  ;;  %v2266_v3 = vld [vmem:[%s5083_s0 + $0x10] sm:$0xf] }
  0x7a   :  { %1555 = vmatpush.bf16.msrb.mxu3 %v386_v45 }
  0x7b   :  { %1640 = vmatpush.bf16.msrb.mxu0 %v392_v51 }
  0x7c   :  { %1723 = vmatpush.bf16.msrb.mxu1 %v400_v55 }
  0x7e   :  { %1556 = vmatpush.bf16.msrb.mxu3 %v385_v50 }
  0x82   :  { %1557 = vmatpush.bf16.msrb.mxu3 %v384_v25  ;;  %v2690_v25 = vld [vmem:[%s5083_s0 + $0x370] sm:$0xf] }
  0x83   :  { %1339 = vmatmul.bf16.gmra.mxu0 %v2515_v31  ;;  %1535 = vmatmul.bf16.vlgmr.msra.gmra.mxu3 %v2787_v17  ;;  %v282_v17 = vld [vmem:[%s5082_s1 + $0x300] sm:$0xff]  ;;  %v2691_v9 = vor.u32 %v2994_v62, %v2690_v25 }
  0x84   :  { %1422 = vmatmul.bf16.gmra.mxu1 %v2519_v32  ;;  %v2646_v32 = vld [vmem:[%s5083_s0 + $0x318] sm:$0xf]  ;;  %v408_v36 = vpack.c.bf16 %v283_v26, %v282_v17  ;;  %v328_v26 = vld [vmem:[%s5082_s1 + $0x470] sm:$0xff] }
  0x85   :  { %1505 = vmatmul.bf16.gmra.mxu2 %v2523_v33  ;;  %v2983_v33 = vld [vmem:[%s5083_s0 + $0x340] sm:$0xf0] }
  0x86   :  { %1806 = vmatpush.bf16.msrb.mxu2 %v408_v36  ;;  %v2647_v53 = vor.u32 %v2983_v33, %v2646_v32  ;;  %v329_v32 = vld [vmem:[%s5082_s1 + $0x478] sm:$0xff]  ;;  %v344_v33 = vld [vmem:[%s5082_s1 + $0x4f0] sm:$0xff]  ;;  %v2734_v36 = vld [vmem:[%s5083_s0 + $0x3c8] sm:$0xf] }
  0x87   :  { %v431_v38 = vpack.c.bf16 %v329_v32, %v328_v26 }
  0x89   :  { %1965 = vmatpush.bf16.msra.mxu0 %v431_v38 }
  0x93   :  { %1344 = vmatmul.bf16.gmra.mxu0 %v2559_v58  ;;  %1540 = vmatmul.bf16.gmra.mxu3 %v2831_v59 }
  0x94   :  { %1427 = vmatmul.bf16.gmra.mxu1 %v2563_v60 }
  0x95   :  { %1510 = vmatmul.bf16.gmra.mxu2 %v2567_v61 }
  0xa0   :  { %v1310_v0 = vpop.f32.mrf.mxu0 }
  0xa1   :  { %v1393_v8 = vpop.f32.mrf.mxu1 }
  0xa2   :  { %v1394_v19 = vadd.f32 %v1393_v8, %v1310_v0 }
  0xa3   :  { %1349 = vmatmul.bf16.gmra.mxu0 %v2603_v18  ;;  %1545 = vmatmul.bf16.gmra.mxu3 %v1096_v21  ;;  %v312_v18 = vld [vmem:[%s5082_s1 + $0x3f0] sm:$0xff]  ;;  %v313_v21 = vld [vmem:[%s5082_s1 + $0x3f8] sm:$0xff] }
  0xa4   :  { %1432 = vmatmul.bf16.gmra.mxu1 %v2607_v22  ;;  %v423_v0 = vpack.c.bf16 %v313_v21, %v312_v18  ;;  %v358_v22 = vld [vmem:[%s5082_s1 + $0x560] sm:$0xff]  ;;  %v2271_v21 = vor.u32 %v2881_v4, %v2268_v43 }
  0xa5   :  { %1515 = vmatmul.bf16.gmra.mxu2 %v2611_v23  ;;  %v359_v23 = vld [vmem:[%s5082_s1 + $0x568] sm:$0xff] }
  0xa6   :  { %v3663_v24 = vpop.f32.mrf.mxu3  ;;  %1882 = vmatpush.bf16.msra.mxu3 %v423_v0  ;;  %v446_v8 = vpack.c.bf16 %v359_v23, %v358_v22 }
  0xa8   :  { %v1476_v27 = vpop.f32.mrf.mxu2  ;;  %v1312_v29 = vpop.f32.mrf.mxu0  ;;  %2132 = vmatpush.bf16.msra.mxu2 %v446_v8  ;;  %v310_v8 = vld [vmem:[%s5082_s1 + $0x3e0] sm:$0xff] }
  0xa9   :  { %v3665_v28 = vadd.f32 %v1476_v27, %v1394_v19  ;;  %v1395_v30 = vpop.f32.mrf.mxu1 }
  0xaa   :  { %v1396_v31 = vadd.f32 %v1395_v30, %v1312_v29 }
  0xae   :  { %v3697_v44 = vpop.f32.mrf.mxu3 }
  0xb0   :  { %v1478_v42 = vpop.f32.mrf.mxu2  ;;  %v1315_v46 = vpop.f32.mrf.mxu0 }
  0xb1   :  { %v3699_v45 = vadd.f32 %v1478_v42, %v1396_v31  ;;  %v1398_v49 = vpop.f32.mrf.mxu1  ;;  %v439_v42 = vpack.c.bf16 %v345_v39, %v344_v33  ;;  %v356_v33 = vld [vmem:[%s5082_s1 + $0x550] sm:$0xff] }
  0xb2   :  { %v1399_v50 = vadd.f32 %v1398_v49, %v1315_v46  ;;  %v3006_v46 = vld [vmem:[%s5083_s0 + $0x3f8] sm:$0xf0]  ;;  %v2735_v49 = vor.u32 %v3005_v37, %v2734_v36  ;;  %v326_v37 = vld [vmem:[%s5082_s1 + $0x460] sm:$0xff] }
  0xb3   :  { %1354 = vmatmul.bf16.gmra.mxu0 %v2647_v53  ;;  %1558 = vmatmul.bf16.vlgmr.msrb.gmra.mxu3 %v2263_v1  ;;  %v2736_v53 = vld [vmem:[%s5083_s0 + $0x3f4] sm:$0xf0]  ;;  %v2742_v1 = vld [vmem:[%s5083_s0 + $0x3d0] sm:$0xf] }
  0xb4   :  { %1437 = vmatmul.bf16.gmra.mxu1 %v2651_v47  ;;  %v2739_v20 = vor.u32 %v3000_v40, %v2736_v53  ;;  %v2743_v51 = vor.u32 %v3006_v46, %v2742_v1  ;;  %v357_v36 = vld [vmem:[%s5082_s1 + $0x558] sm:$0xff]  ;;  %v342_v40 = vld [vmem:[%s5082_s1 + $0x4e0] sm:$0xff]  ;;  %v2924_v1 = vld [vmem:[%s5083_s0 + $0x16c] sm:$0xf] }
  0xb5   :  { %1520 = vmatmul.bf16.gmra.mxu2 %v2655_v48  ;;  %2048 = vmatpush.bf16.msra.mxu1 %v439_v42  ;;  %v445_v39 = vpack.c.bf16 %v357_v36, %v356_v33  ;;  %v2436_v46 = vld [vmem:[%s5083_s0 + $0x194] sm:$0xf0]  ;;  %v308_v36 = vld [vmem:[%s5082_s1 + $0x3d0] sm:$0xff] }
  0xb6   :  { %v3713_v56 = vpop.f32.mrf.mxu3 }
  0xb7   :  { %2133 = vmatpush.bf16.msra.mxu2 %v445_v39 }
  0xb8   :  { %v1481_v57 = vpop.f32.mrf.mxu2  ;;  %v1317_v59 = vpop.f32.mrf.mxu0 }
  0xb9   :  { %v3715_v58 = vadd.f32 %v1481_v57, %v1399_v50  ;;  %v1400_v60 = vpop.f32.mrf.mxu1  ;;  %v2351_v50 = vor.u32 %v2902_v41, %v2348_v35  ;;  %v343_v41 = vld [vmem:[%s5082_s1 + $0x4e8] sm:$0xff] }
  0xba   :  { %v1401_v61 = vadd.f32 %v1400_v60, %v1317_v59  ;;  %v438_v53 = vpack.c.bf16 %v343_v41, %v342_v40  ;;  %v324_v40 = vld [vmem:[%s5082_s1 + $0x450] sm:$0xff]  ;;  %v325_v41 = vld [vmem:[%s5082_s1 + $0x458] sm:$0xff] }
  0xbc   :  { %2049 = vmatpush.bf16.msra.mxu1 %v438_v53  ;;  %v341_v53 = vld [vmem:[%s5082_s1 + $0x4d8] sm:$0xff] }
  0xbe   :  { %v3741_v5 = vpop.f32.mrf.mxu3 }
  0xc0   :  { %v1483_v6 = vpop.f32.mrf.mxu2  ;;  %v1320_v52 = vpop.f32.mrf.mxu0 }
  0xc1   :  { %v3743_v11 = vadd.f32 %v1483_v6, %v1401_v61  ;;  %v1403_v14 = vpop.f32.mrf.mxu1  ;;  %v2274_v6 = vld [vmem:[%s5083_s0 + $0x18] sm:$0xf] }
  0xc2   :  { %v1404_v15 = vadd.f32 %v1403_v14, %v1320_v52 }
  0xc3   :  { %1359 = vmatmul.bf16.gmra.mxu0 %v2691_v9  ;;  %1563 = vmatmul.bf16.gmra.mxu3 %v2307_v10  ;;  %v2887_v9 = vld [vmem:[%s5083_s0 + $0x40] sm:$0xf0] }
  0xc4   :  { %1442 = vmatmul.bf16.gmra.mxu1 %v2695_v12  ;;  %v2275_v0 = vor.u32 %v2887_v9, %v2274_v6 }
  0xc5   :  { %1525 = vmatmul.bf16.gmra.mxu2 %v2699_v13  ;;  %v2395_v13 = vor.u32 %v2913_v63, %v2392_v2 }
  0xc6   :  { %v3757_v19 = vpop.f32.mrf.mxu3 }
  0xc8   :  { %v1486_v27 = vpop.f32.mrf.mxu2  ;;  %v1322_v30 = vpop.f32.mrf.mxu0 }
  0xc9   :  { %v3759_v29 = vadd.f32 %v1486_v27, %v1404_v15  ;;  %v1405_v31 = vpop.f32.mrf.mxu1  ;;  %v311_v27 = vld [vmem:[%s5082_s1 + $0x3e8] sm:$0xff] }
  0xca   :  { %v1406_v17 = vadd.f32 %v1405_v31, %v1322_v30 }
  0xce   :  { %v1382_v47 = vpop.f32.mrf.mxu3 }
  0xcf   :  { %v2310_v47 = vld [vmem:[%s5083_s0 + $0x68] sm:$0xf] }
  0xd0   :  { %v1488_v48 = vpop.f32.mrf.mxu2  ;;  %v1325_v16 = vpop.f32.mrf.mxu0 }
  0xd1   :  { %v3797_v7 = vadd.f32 %v1488_v48, %v1406_v17  ;;  %v1408_v54 = vpop.f32.mrf.mxu1  ;;  %v2897_v48 = vld [vmem:[%s5083_s0 + $0x90] sm:$0xf0] }
  0xd2   :  { %v1409_v55 = vadd.f32 %v1408_v54, %v1325_v16  ;;  %v2318_v16 = vld [vmem:[%s5083_s0 + $0x70] sm:$0xf] }
  0xd3   :  { %1364 = vmatmul.bf16.gmra.mxu0 %v2735_v49  ;;  %1568 = vmatmul.bf16.gmra.mxu3 %v2351_v50  ;;  %v2892_v49 = vld [vmem:[%s5083_s0 + $0x6c] sm:$0xf]  ;;  %v2312_v50 = vld [vmem:[%s5083_s0 + $0x94] sm:$0xf0] }
  0xd4   :  { %1447 = vmatmul.bf16.gmra.mxu1 %v2739_v20  ;;  %v2898_v20 = vld [vmem:[%s5083_s0 + $0x98] sm:$0xf0] }
  0xd5   :  { %1530 = vmatmul.bf16.gmra.mxu2 %v2743_v51  ;;  %v2319_v63 = vor.u32 %v2898_v20, %v2318_v16 }
  0xd6   :  { %v1453_v57 = vpop.f32.mrf.mxu3 }
  0xd7   :  { %v3800_v59 = vadd.f32 %v1453_v57, %v3663_v24  ;;  %v2886_v24 = vld [vmem:[%s5083_s0 + $0x38] sm:$0xf0]  ;;  %v2439_v57 = vor.u32 %v2924_v1, %v2436_v46 }
  0xd8   :  { %v1491_v60 = vpop.f32.mrf.mxu2  ;;  %v1327_v25 = vpop.f32.mrf.mxu0  ;;  %v2267_v14 = vor.u32 %v2886_v24, %v2266_v3 }
  0xd9   :  { %v3802_v61 = vadd.f32 %v1491_v60, %v1409_v55  ;;  %v1410_v62 = vpop.f32.mrf.mxu1  ;;  %v2311_v60 = vor.u32 %v2897_v48, %v2310_v47 }
  0xda   :  { %v1411_v34 = vadd.f32 %v1410_v62, %v1327_v25 }
  0xde   :  { %v1455_v10 = vpop.f32.mrf.mxu3 }
  0xdf   :  { %v3829_v52 = vadd.f32 %v1455_v10, %v3697_v44  ;;  %v422_v44 = vpack.c.bf16 %v311_v27, %v310_v8 }
  0xe0   :  { %v1493_v12 = vpop.f32.mrf.mxu2  ;;  %v1330_v18 = vpop.f32.mrf.mxu0 }
  0xe1   :  { %v3831_v15 = vadd.f32 %v1493_v12, %v1411_v34  ;;  %v1413_v22 = vpop.f32.mrf.mxu1  ;;  %1883 = vmatpush.bf16.msra.mxu3 %v422_v44  ;;  %v2315_v34 = vor.u32 %v2892_v49, %v2312_v50  ;;  %v2935_v12 = vld [vmem:[%s5083_s0 + $0x1c4] sm:$0xf] }
  0xe2   :  { %v1414_v23 = vadd.f32 %v1413_v22, %v1330_v18  ;;  %v2903_v18 = vld [vmem:[%s5083_s0 + $0xc4] sm:$0xf]  ;;  %v2909_v22 = vld [vmem:[%s5083_s0 + $0xf0] sm:$0xf0] }
  0xe3   :  { %1573 = vmatmul.bf16.gmra.mxu3 %v2395_v13  ;;  %1641 = vmatmul.bf16.vlgmr.msrb.gmra.mxu0 %v2267_v14  ;;  %v2480_v13 = vld [vmem:[%s5083_s0 + $0x1ec] sm:$0xf0]  ;;  %v2354_v14 = vld [vmem:[%s5083_s0 + $0xc0] sm:$0xf] }
  0xe4   :  { %1724 = vmatmul.bf16.vlgmr.msrb.gmra.mxu1 %v2271_v21  ;;  %v2356_v21 = vld [vmem:[%s5083_s0 + $0xec] sm:$0xf0]  ;;  %v2483_v27 = vor.u32 %v2935_v12, %v2480_v13 }
  0xe5   :  { %1807 = vmatmul.bf16.vlgmr.msrb.gmra.mxu2 %v2275_v0  ;;  %v2362_v0 = vld [vmem:[%s5083_s0 + $0xc8] sm:$0xf] }
  0xe6   :  { %v1458_v30 = vpop.f32.mrf.mxu3  ;;  %v2363_v33 = vor.u32 %v2909_v22, %v2362_v0 }
  0xe7   :  { %v3840_v31 = vadd.f32 %v1458_v30, %v3713_v56  ;;  %v327_v56 = vld [vmem:[%s5082_s1 + $0x468] sm:$0xff] }
  0xe8   :  { %v1496_v17 = vpop.f32.mrf.mxu2  ;;  %v1332_v32 = vpop.f32.mrf.mxu0  ;;  %v430_v42 = vpack.c.bf16 %v327_v56, %v326_v37  ;;  %v309_v37 = vld [vmem:[%s5082_s1 + $0x3d8] sm:$0xff] }
  0xe9   :  { %v3842_v26 = vadd.f32 %v1496_v17, %v1414_v23  ;;  %v1415_v38 = vpop.f32.mrf.mxu1  ;;  %v421_v39 = vpack.c.bf16 %v309_v37, %v308_v36  ;;  %v2957_v36 = vld [vmem:[%s5083_s0 + $0x274] sm:$0xf] }
  0xea   :  { %v1416_v35 = vadd.f32 %v1415_v38, %v1332_v32  ;;  %1966 = vmatpush.bf16.msra.mxu0 %v430_v42  ;;  %v2359_v32 = vor.u32 %v2903_v18, %v2356_v21  ;;  %v429_v42 = vpack.c.bf16 %v325_v41, %v324_v40  ;;  %v2444_v40 = vld [vmem:[%s5083_s0 + $0x19c] sm:$0xf0]  ;;  %v2450_v41 = vld [vmem:[%s5083_s0 + $0x178] sm:$0xf] }
  0xeb   :  { %1884 = vmatpush.bf16.msra.mxu3 %v421_v39  ;;  %v2930_v39 = vld [vmem:[%s5083_s0 + $0x198] sm:$0xf0] }
  0xee   :  { %v1460_v51 = vpop.f32.mrf.mxu3  ;;  %1967 = vmatpush.bf16.msra.mxu0 %v429_v42 }
  0xef   :  { %v3887_v54 = vadd.f32 %v1460_v51, %v3741_v5  ;;  %v354_v51 = vld [vmem:[%s5082_s1 + $0x540] sm:$0xff] }
  0xf0   :  { %v1498_v55 = vpop.f32.mrf.mxu2  ;;  %v1335_v62 = vpop.f32.mrf.mxu0 }
  0xf1   :  { %v3889_v25 = vadd.f32 %v1498_v55, %v1416_v35  ;;  %v1418_v2 = vpop.f32.mrf.mxu1  ;;  %v340_v35 = vld [vmem:[%s5082_s1 + $0x4d0] sm:$0xff]  ;;  %v355_v55 = vld [vmem:[%s5082_s1 + $0x548] sm:$0xff] }
  0xf2   :  { %v1419_v3 = vadd.f32 %v1418_v2, %v1335_v62  ;;  %v437_v46 = vpack.c.bf16 %v341_v53, %v340_v35  ;;  %v2398_v62 = vld [vmem:[%s5083_s0 + $0x118] sm:$0xf]  ;;  %v2400_v2 = vld [vmem:[%s5083_s0 + $0x144] sm:$0xf0]  ;;  %v2931_v35 = vld [vmem:[%s5083_s0 + $0x1a0] sm:$0xf0] }
  0xf3   :  { %1578 = vmatmul.bf16.gmra.mxu3 %v2439_v57  ;;  %1646 = vmatmul.bf16.gmra.mxu0 %v2311_v60  ;;  %v2524_v57 = vld [vmem:[%s5083_s0 + $0x244] sm:$0xf0]  ;;  %v444_v60 = vpack.c.bf16 %v355_v55, %v354_v51  ;;  %v2451_v51 = vor.u32 %v2931_v35, %v2450_v41 }
  0xf4   :  { %1729 = vmatmul.bf16.gmra.mxu1 %v2315_v34  ;;  %v2919_v34 = vld [vmem:[%s5083_s0 + $0x140] sm:$0xf0] }
  0xf5   :  { %1812 = vmatmul.bf16.gmra.mxu2 %v2319_v63  ;;  %2050 = vmatpush.bf16.msra.mxu1 %v437_v46  ;;  %v2914_v63 = vld [vmem:[%s5083_s0 + $0x11c] sm:$0xf]  ;;  %v2399_v12 = vor.u32 %v2919_v34, %v2398_v62  ;;  %v339_v34 = vld [vmem:[%s5082_s1 + $0x4c8] sm:$0xff] }
  0xf6   :  { %v1463_v24 = vpop.f32.mrf.mxu3  ;;  %2134 = vmatpush.bf16.msra.mxu2 %v444_v60  ;;  %v338_v60 = vld [vmem:[%s5082_s1 + $0x4c0] sm:$0xff] }
  0xf7   :  { %v3892_v4 = vadd.f32 %v1463_v24, %v3757_v19  ;;  %v2908_v19 = vld [vmem:[%s5083_s0 + $0xe8] sm:$0xf0] }
  0xf8   :  { %v1501_v5 = vpop.f32.mrf.mxu2  ;;  %v1337_v6 = vpop.f32.mrf.mxu0  ;;  %v2355_v44 = vor.u32 %v2908_v19, %v2354_v14  ;;  %v2920_v24 = vld [vmem:[%s5083_s0 + $0x148] sm:$0xf0]  ;;  %v2403_v19 = vor.u32 %v2914_v63, %v2400_v2  ;;  %v436_v2 = vpack.c.bf16 %v339_v34, %v338_v60  ;;  %v2532_v34 = vld [vmem:[%s5083_s0 + $0x24c] sm:$0xf0] }
  0xf9   :  { %v3894_v43 = vadd.f32 %v1501_v5, %v1419_v3  ;;  %v1420_v9 = vpop.f32.mrf.mxu1  ;;  %v2406_v3 = vld [vmem:[%s5083_s0 + $0x120] sm:$0xf]  ;;  %v2952_v60 = vld [vmem:[%s5083_s0 + $0x248] sm:$0xf0] }
  0xfa   :  { %v1421_v10 = vadd.f32 %v1420_v9, %v1337_v6  ;;  %v2407_v18 = vor.u32 %v2920_v24, %v2406_v3  ;;  %2051 = vmatpush.bf16.msra.mxu1 %v436_v2  ;;  %v2953_v2 = vld [vmem:[%s5083_s0 + $0x250] sm:$0xf0] }
  0xfe   :  { %v1465_v23 = vpop.f32.mrf.mxu3 }
 0x100   :  { %v1503_v8 = vpop.f32.mrf.mxu2  ;;  %v1340_v17 = vpop.f32.mrf.mxu0 }
 0x101   :  { %v3920_v30 = vadd.f32 %v1503_v8, %v1421_v10  ;;  %v1423_v38 = vpop.f32.mrf.mxu1 }
 0x102   :  { %v1424_v56 = vadd.f32 %v1423_v38, %v1340_v17  ;;  %v2442_v38 = vld [vmem:[%s5083_s0 + $0x170] sm:$0xf] }
 0x103   :  { %1583 = vmatmul.bf16.gmra.mxu3 %v2483_v27  ;;  %1651 = vmatmul.bf16.gmra.mxu0 %v2355_v44 }
 0x104   :  { %1734 = vmatmul.bf16.gmra.mxu1 %v2359_v32  ;;  %v306_v32 = vld [vmem:[%s5082_s1 + $0x3c0] sm:$0xff] }
 0x105   :  { %1817 = vmatmul.bf16.gmra.mxu2 %v2363_v33  ;;  %v307_v33 = vld [vmem:[%s5082_s1 + $0x3c8] sm:$0xff] }
 0x106   :  { %v1536_v1 = vpop.f32.mrf.mxu3  ;;  %v420_v37 = vpack.c.bf16 %v307_v33, %v306_v32 }
 0x107   :  { %v3941_v48 = vadd.f32 %v1536_v1, %v3800_v59  ;;  %v2946_v59 = vld [vmem:[%s5083_s0 + $0x21c] sm:$0xf] }
 0x108   :  { %v1506_v47 = vpop.f32.mrf.mxu2  ;;  %v1342_v50 = vpop.f32.mrf.mxu0  ;;  %v2527_v10 = vor.u32 %v2946_v59, %v2524_v57  ;;  %1885 = vmatpush.bf16.msra.mxu3 %v420_v37  ;;  %v322_v57 = vld [vmem:[%s5082_s1 + $0x440] sm:$0xff] }
 0x109   :  { %v3943_v49 = vadd.f32 %v1506_v47, %v1424_v56  ;;  %v1425_v16 = vpop.f32.mrf.mxu1  ;;  %v2925_v56 = vld [vmem:[%s5083_s0 + $0x174] sm:$0xf]  ;;  %v2443_v47 = vor.u32 %v2930_v39, %v2442_v38 }
 0x10a   :  { %v1426_v20 = vadd.f32 %v1425_v16, %v1342_v50 }
 0x10e   :  { %v1538_v5 = vpop.f32.mrf.mxu3 }
 0x10f   :  { %v3976_v9 = vadd.f32 %v1538_v5, %v3829_v52 }
 0x110   :  { %v1508_v6 = vpop.f32.mrf.mxu2  ;;  %v1345_v14 = vpop.f32.mrf.mxu0 }
 0x111   :  { %v3978_v13 = vadd.f32 %v1508_v6, %v1426_v20  ;;  %v1428_v21 = vpop.f32.mrf.mxu1  ;;  %v2447_v20 = vor.u32 %v2925_v56, %v2444_v40 }
 0x112   :  { %v1429_v0 = vadd.f32 %v1428_v21, %v1345_v14  ;;  %v352_v14 = vld [vmem:[%s5082_s1 + $0x530] sm:$0xff] }
 0x113   :  { %1588 = vmatmul.bf16.gmra.mxu3 %v2527_v10  ;;  %1656 = vmatmul.bf16.gmra.mxu0 %v2399_v12 }
 0x114   :  { %1739 = vmatmul.bf16.gmra.mxu1 %v2403_v19  ;;  %v353_v19 = vld [vmem:[%s5082_s1 + $0x538] sm:$0xff] }
 0x115   :  { %1822 = vmatmul.bf16.gmra.mxu2 %v2407_v18  ;;  %v2612_v18 = vld [vmem:[%s5083_s0 + $0x2f4] sm:$0xf0]  ;;  %v443_v21 = vpack.c.bf16 %v353_v19, %v352_v14 }
 0x116   :  { %v1541_v22 = vpop.f32.mrf.mxu3 }
 0x117   :  { %v3981_v8 = vadd.f32 %v1541_v22, %v3840_v31  ;;  %v2568_v31 = vld [vmem:[%s5083_s0 + $0x29c] sm:$0xf0]  ;;  %v2941_v22 = vld [vmem:[%s5083_s0 + $0x1f0] sm:$0xf0]  ;;  %2135 = vmatpush.bf16.msra.mxu2 %v443_v21 }
 0x118   :  { %v1511_v23 = vpop.f32.mrf.mxu2  ;;  %v1347_v27 = vpop.f32.mrf.mxu0  ;;  %v2571_v46 = vor.u32 %v2957_v36, %v2568_v31 }
 0x119   :  { %v3983_v52 = vadd.f32 %v1511_v23, %v1429_v0  ;;  %v1430_v44 = vpop.f32.mrf.mxu1  ;;  %v2486_v0 = vld [vmem:[%s5083_s0 + $0x1c8] sm:$0xf]  ;;  %v2936_v23 = vld [vmem:[%s5083_s0 + $0x1cc] sm:$0xf] }
 0x11a   :  { %v1431_v17 = vadd.f32 %v1430_v44, %v1347_v27  ;;  %v2488_v27 = vld [vmem:[%s5083_s0 + $0x1f4] sm:$0xf0]  ;;  %v2494_v44 = vld [vmem:[%s5083_s0 + $0x1d0] sm:$0xf]  ;;  %v2487_v31 = vor.u32 %v2941_v22, %v2486_v0 }
 0x11b   :  { %v2491_v39 = vor.u32 %v2936_v23, %v2488_v27  ;;  %v320_v23 = vld [vmem:[%s5082_s1 + $0x430] sm:$0xff] }
 0x11c   :  { %v336_v27 = vld [vmem:[%s5082_s1 + $0x4b0] sm:$0xff] }
 0x11e   :  { %v1543_v42 = vpop.f32.mrf.mxu3 }
 0x11f   :  { %v4016_v1 = vadd.f32 %v1543_v42, %v3887_v54  ;;  %v323_v54 = vld [vmem:[%s5082_s1 + $0x448] sm:$0xff] }
 0x120   :  { %v1513_v53 = vpop.f32.mrf.mxu2  ;;  %v1350_v16 = vpop.f32.mrf.mxu0  ;;  %v428_v62 = vpack.c.bf16 %v323_v54, %v322_v57  ;;  %v2530_v54 = vld [vmem:[%s5083_s0 + $0x220] sm:$0xf] }
 0x121   :  { %v4018_v50 = vadd.f32 %v1513_v53, %v1431_v17  ;;  %v1433_v55 = vpop.f32.mrf.mxu1  ;;  %v2942_v17 = vld [vmem:[%s5083_s0 + $0x1f8] sm:$0xf0]  ;;  %v2531_v14 = vor.u32 %v2952_v60, %v2530_v54 }
 0x122   :  { %v1434_v59 = vadd.f32 %v1433_v55, %v1350_v16  ;;  %1968 = vmatpush.bf16.msra.mxu0 %v428_v62  ;;  %v2495_v56 = vor.u32 %v2942_v17, %v2494_v44  ;;  %v305_v55 = vld [vmem:[%s5082_s1 + $0x3b8] sm:$0xff]  ;;  %v2947_v62 = vld [vmem:[%s5083_s0 + $0x224] sm:$0xf] }
 0x123   :  { %1593 = vmatmul.bf16.gmra.mxu3 %v2571_v46  ;;  %1661 = vmatmul.bf16.gmra.mxu0 %v2443_v47  ;;  %v337_v17 = vld [vmem:[%s5082_s1 + $0x4b8] sm:$0xff] }
 0x124   :  { %1744 = vmatmul.bf16.gmra.mxu1 %v2447_v20 }
 0x125   :  { %1827 = vmatmul.bf16.gmra.mxu2 %v2451_v51  ;;  %v304_v51 = vld [vmem:[%s5082_s1 + $0x3b0] sm:$0xff] }
 0x126   :  { %v1546_v63 = vpop.f32.mrf.mxu3  ;;  %v419_v57 = vpack.c.bf16 %v305_v55, %v304_v51  ;;  %v2576_v55 = vld [vmem:[%s5083_s0 + $0x2a4] sm:$0xf0] }
 0x127   :  { %v4033_v24 = vadd.f32 %v1546_v63, %v3892_v4  ;;  %v2968_v4 = vld [vmem:[%s5083_s0 + $0x2cc] sm:$0xf]  ;;  %v2538_v63 = vld [vmem:[%s5083_s0 + $0x228] sm:$0xf] }
 0x128   :  { %v1516_v3 = vpop.f32.mrf.mxu2  ;;  %v1352_v6 = vpop.f32.mrf.mxu0  ;;  %v2615_v36 = vor.u32 %v2968_v4, %v2612_v18  ;;  %1886 = vmatpush.bf16.msra.mxu3 %v419_v57  ;;  %v2535_v18 = vor.u32 %v2947_v62, %v2532_v34  ;;  %v2539_v21 = vor.u32 %v2953_v2, %v2538_v63 }
 0x129   :  { %v4035_v5 = vadd.f32 %v1516_v3, %v1434_v59  ;;  %v1435_v10 = vpop.f32.mrf.mxu1  ;;  %v2979_v59 = vld [vmem:[%s5083_s0 + $0x324] sm:$0xf] }
 0x12a   :  { %v1436_v12 = vadd.f32 %v1435_v10, %v1352_v6 }
 0x12e   :  { %v1548_v32 = vpop.f32.mrf.mxu3 }
 0x12f   :  { %v435_v32 = vpack.c.bf16 %v337_v17, %v336_v27  ;;  %v2744_v27 = vld [vmem:[%s5083_s0 + $0x3fc] sm:$0xf0]  ;;  %v2618_v17 = vld [vmem:[%s5083_s0 + $0x2d0] sm:$0xf] }
 0x130   :  { %v1518_v33 = vpop.f32.mrf.mxu2  ;;  %v1355_v38 = vpop.f32.mrf.mxu0 }
 0x131   :  { %v4067_v37 = vadd.f32 %v1518_v33, %v1436_v12  ;;  %v1438_v40 = vpop.f32.mrf.mxu1  ;;  %2052 = vmatpush.bf16.msra.mxu1 %v435_v32  ;;  %v2974_v32 = vld [vmem:[%s5083_s0 + $0x2f8] sm:$0xf0] }
 0x132   :  { %v1439_v41 = vadd.f32 %v1438_v40, %v1355_v38 }
 0x133   :  { %1598 = vmatmul.bf16.gmra.mxu3 %v2615_v36  ;;  %1666 = vmatmul.bf16.gmra.mxu0 %v2487_v31 }
 0x134   :  { %1749 = vmatmul.bf16.gmra.mxu1 %v2491_v39 }
 0x135   :  { %1832 = vmatmul.bf16.gmra.mxu2 %v2495_v56 }
 0x136   :  { %v1559_v35 = vpop.f32.mrf.mxu3 }
 0x137   :  { %v4070_v53 = vadd.f32 %v1559_v35, %v3665_v28  ;;  %v2656_v28 = vld [vmem:[%s5083_s0 + $0x34c] sm:$0xf0]  ;;  %v2700_v35 = vld [vmem:[%s5083_s0 + $0x3a4] sm:$0xf0] }
 0x138   :  { %v1521_v42 = vpop.f32.mrf.mxu2  ;;  %v1357_v47 = vpop.f32.mrf.mxu0  ;;  %v2659_v12 = vor.u32 %v2979_v59, %v2656_v28  ;;  %v2582_v59 = vld [vmem:[%s5083_s0 + $0x280] sm:$0xf]  ;;  %v2964_v28 = vld [vmem:[%s5083_s0 + $0x2a8] sm:$0xf0] }
 0x139   :  { %v4072_v46 = vadd.f32 %v1521_v42, %v1439_v41  ;;  %v1440_v16 = vpop.f32.mrf.mxu1  ;;  %v2990_v41 = vld [vmem:[%s5083_s0 + $0x37c] sm:$0xf]  ;;  %v350_v42 = vld [vmem:[%s5082_s1 + $0x520] sm:$0xff] }
 0x13a   :  { %v1441_v20 = vadd.f32 %v1440_v16, %v1357_v47  ;;  %v2574_v47 = vld [vmem:[%s5083_s0 + $0x278] sm:$0xf]  ;;  %v2963_v16 = vld [vmem:[%s5083_s0 + $0x2a0] sm:$0xf0]  ;;  %v2703_v62 = vor.u32 %v2990_v41, %v2700_v35 }
 0x13b   :  { %v2575_v34 = vor.u32 %v2963_v16, %v2574_v47  ;;  %v2619_v47 = vor.u32 %v2974_v32, %v2618_v17  ;;  %v2986_v17 = vld [vmem:[%s5083_s0 + $0x358] sm:$0xf0] }
 0x13e   :  { %v1561_v3 = vpop.f32.mrf.mxu3 }
 0x13f   :  { %v4105_v10 = vadd.f32 %v1561_v3, %v3699_v45  ;;  %v321_v45 = vld [vmem:[%s5082_s1 + $0x438] sm:$0xff] }
 0x140   :  { %v1523_v6 = vpop.f32.mrf.mxu2  ;;  %v1360_v4 = vpop.f32.mrf.mxu0  ;;  %v427_v44 = vpack.c.bf16 %v321_v45, %v320_v23  ;;  %v3001_v45 = vld [vmem:[%s5083_s0 + $0x3d4] sm:$0xf] }
 0x141   :  { %v4107_v19 = vadd.f32 %v1523_v6, %v1441_v20  ;;  %v1443_v0 = vpop.f32.mrf.mxu1  ;;  %v2958_v20 = vld [vmem:[%s5083_s0 + $0x27c] sm:$0xf]  ;;  %v2583_v6 = vor.u32 %v2964_v28, %v2582_v59  ;;  %v318_v59 = vld [vmem:[%s5082_s1 + $0x420] sm:$0xff]  ;;  %v319_v28 = vld [vmem:[%s5082_s1 + $0x428] sm:$0xff] }
 0x142   :  { %v1444_v22 = vadd.f32 %v1443_v0, %v1360_v4  ;;  %1969 = vmatpush.bf16.msra.mxu0 %v427_v44  ;;  %v2579_v3 = vor.u32 %v2958_v20, %v2576_v55  ;;  %v302_v44 = vld [vmem:[%s5082_s1 + $0x3a0] sm:$0xff] }
 0x143   :  { %1603 = vmatmul.bf16.gmra.mxu3 %v2659_v12  ;;  %1671 = vmatmul.bf16.gmra.mxu0 %v2531_v14 }
 0x144   :  { %1754 = vmatmul.bf16.gmra.mxu1 %v2535_v18 }
 0x145   :  { %1837 = vmatmul.bf16.gmra.mxu2 %v2539_v21 }
 0x146   :  { %v1564_v33 = vpop.f32.mrf.mxu3 }
 0x147   :  { %v4122_v31 = vadd.f32 %v1564_v33, %v3715_v58  ;;  %v351_v58 = vld [vmem:[%s5082_s1 + $0x528] sm:$0xff]  ;;  %v2969_v33 = vld [vmem:[%s5083_s0 + $0x2d4] sm:$0xf] }
 0x148   :  { %v1526_v36 = vpop.f32.mrf.mxu2  ;;  %v1362_v39 = vpop.f32.mrf.mxu0  ;;  %v442_v51 = vpack.c.bf16 %v351_v58, %v350_v42  ;;  %v2747_v58 = vor.u32 %v3001_v45, %v2744_v27  ;;  %v2788_v45 = vld [vmem:[%s5083_s0 + $0x454] sm:$0xf0]  ;;  %v2985_v27 = vld [vmem:[%s5083_s0 + $0x350] sm:$0xf0] }
 0x149   :  { %v4124_v38 = vadd.f32 %v1526_v36, %v1444_v22  ;;  %v1445_v56 = vpop.f32.mrf.mxu1 }
 0x14a   :  { %v1446_v40 = vadd.f32 %v1445_v56, %v1362_v39  ;;  %2136 = vmatpush.bf16.msra.mxu2 %v442_v51  ;;  %v2620_v39 = vld [vmem:[%s5083_s0 + $0x2fc] sm:$0xf0]  ;;  %v2626_v56 = vld [vmem:[%s5083_s0 + $0x2d8] sm:$0xf] }
 0x14b   :  { %v2623_v51 = vor.u32 %v2969_v33, %v2620_v39 }
 0x14e   :  { %v1566_v57 = vpop.f32.mrf.mxu3 }
 0x14f   :  { %v4157_v60 = vadd.f32 %v1566_v57, %v3743_v11 }
 0x150   :  { %v1528_v54 = vpop.f32.mrf.mxu2  ;;  %v1365_v2 = vpop.f32.mrf.mxu0 }
 0x151   :  { %v4159_v63 = vadd.f32 %v1528_v54, %v1446_v40  ;;  %v1448_v12 = vpop.f32.mrf.mxu1  ;;  %v2975_v40 = vld [vmem:[%s5083_s0 + $0x300] sm:$0xf0] }
 0x152   :  { %v1449_v14 = vadd.f32 %v1448_v12, %v1365_v2  ;;  %v2627_v55 = vor.u32 %v2975_v40, %v2626_v56 }
 0x153   :  { %1608 = vmatmul.bf16.gmra.mxu3 %v2703_v62  ;;  %1676 = vmatmul.bf16.gmra.mxu0 %v2575_v34  ;;  %v426_v62 = vpack.c.bf16 %v319_v28, %v318_v59  ;;  %v335_v34 = vld [vmem:[%s5082_s1 + $0x4a8] sm:$0xff] }
 0x154   :  { %1759 = vmatmul.bf16.gmra.mxu1 %v2579_v3 }
 0x155   :  { %1842 = vmatmul.bf16.gmra.mxu2 %v2583_v6  ;;  %1970 = vmatpush.bf16.msra.mxu0 %v426_v62 }
 0x156   :  { %v1569_v4 = vpop.f32.mrf.mxu3 }
 0x157   :  { %v4162_v21 = vadd.f32 %v1569_v4, %v3759_v29  ;;  %v303_v29 = vld [vmem:[%s5082_s1 + $0x3a8] sm:$0xff] }
 0x158   :  { %v1531_v18 = vpop.f32.mrf.mxu2  ;;  %v1367_v0 = vpop.f32.mrf.mxu0  ;;  %v418_v36 = vpack.c.bf16 %v303_v29, %v302_v44  ;;  %v2664_v44 = vld [vmem:[%s5083_s0 + $0x354] sm:$0xf0]  ;;  %v2670_v29 = vld [vmem:[%s5083_s0 + $0x330] sm:$0xf] }
 0x159   :  { %v4164_v11 = vadd.f32 %v1531_v18, %v1449_v14  ;;  %v1450_v22 = vpop.f32.mrf.mxu1 }
 0x15a   :  { %v1451_v23 = vadd.f32 %v1450_v22, %v1367_v0  ;;  %1887 = vmatpush.bf16.msra.mxu3 %v418_v36 }
 0x15e   :  { %v1571_v41 = vpop.f32.mrf.mxu3 }
 0x15f   :  { %v4197_v42 = vadd.f32 %v1571_v41, %v3797_v7  ;;  %v334_v7 = vld [vmem:[%s5082_s1 + $0x4a0] sm:$0xff] }
 0x160   :  { %v1533_v35 = vpop.f32.mrf.mxu2  ;;  %v1642_v20 = vpop.f32.mrf.mxu0  ;;  %v434_v2 = vpack.c.bf16 %v335_v34, %v334_v7  ;;  %v301_v34 = vld [vmem:[%s5082_s1 + $0x398] sm:$0xff] }
 0x161   :  { %v4199_v16 = vadd.f32 %v1533_v35, %v1451_v23  ;;  %v1643_v57 = vadd.f32 %v1642_v20, %v4070_v53  ;;  %v1725_v54 = vpop.f32.mrf.mxu1  ;;  %v3012_v23 = vld [vmem:[%s5083_s0 + $0x42c] sm:$0xf]  ;;  %v349_v20 = vld [vmem:[%s5082_s1 + $0x518] sm:$0xff] }
 0x162   :  { %2053 = vmatpush.bf16.msra.mxu1 %v434_v2  ;;  %v2791_v39 = vor.u32 %v3012_v23, %v2788_v45  ;;  %v2996_v23 = vld [vmem:[%s5083_s0 + $0x3a8] sm:$0xf0]  ;;  %v2991_v45 = vld [vmem:[%s5083_s0 + $0x384] sm:$0xf] }
 0x163   :  { %v1726_v3 = vadd.f32 %v1725_v54, %v1643_v57  ;;  %1613 = vmatmul.bf16.gmra.mxu3 %v2747_v58  ;;  %1681 = vmatmul.bf16.gmra.mxu0 %v2619_v47  ;;  %v2671_v58 = vor.u32 %v2986_v17, %v2670_v29  ;;  %v348_v47 = vld [vmem:[%s5082_s1 + $0x510] sm:$0xff] }
 0x164   :  { %1764 = vmatmul.bf16.gmra.mxu1 %v2623_v51  ;;  %v2997_v29 = vld [vmem:[%s5083_s0 + $0x3b0] sm:$0xf0] }
 0x165   :  { %1847 = vmatmul.bf16.gmra.mxu2 %v2627_v55  ;;  %v441_v55 = vpack.c.bf16 %v349_v20, %v348_v47 }
 0x166   :  { %v1574_v6 = vpop.f32.mrf.mxu3 }
 0x167   :  { %v4215_v12 = vadd.f32 %v1574_v6, %v3802_v61  ;;  %v2662_v61 = vld [vmem:[%s5083_s0 + $0x328] sm:$0xf]  ;;  %2137 = vmatpush.bf16.msra.mxu2 %v441_v55 }
 0x168   :  { %v1808_v14 = vpop.f32.mrf.mxu2  ;;  %v1644_v4 = vpop.f32.mrf.mxu0  ;;  %v2663_v56 = vor.u32 %v2985_v27, %v2662_v61  ;;  %v333_v27 = vld [vmem:[%s5082_s1 + $0x498] sm:$0xff] }
 0x169   :  { %v4217_v53 = vadd.f32 %v1808_v14, %v1726_v3  ;;  %v1645_v18 = vadd.f32 %v1644_v4, %v4105_v10  ;;  %v1727_v0 = vpop.f32.mrf.mxu1  ;;  %v2980_v10 = vld [vmem:[%s5083_s0 + $0x32c] sm:$0xf]  ;;  %v2832_v14 = vld [vmem:[%s5083_s0 + $0x4ac] sm:$0xf0]  ;;  %v2706_v4 = vld [vmem:[%s5083_s0 + $0x380] sm:$0xf] }
 0x16a   :  { %v2667_v35 = vor.u32 %v2980_v10, %v2664_v44  ;;  %v2708_v10 = vld [vmem:[%s5083_s0 + $0x3ac] sm:$0xf0]  ;;  %v2714_v44 = vld [vmem:[%s5083_s0 + $0x388] sm:$0xf] }
 0x16b   :  { %v1728_v22 = vadd.f32 %v1727_v0, %v1645_v18  ;;  %v317_v0 = vld [vmem:[%s5082_s1 + $0x418] sm:$0xff]  ;;  %v2715_v55 = vor.u32 %v2997_v29, %v2714_v44 }
 0x16e   :  { %v1576_v32 = vpop.f32.mrf.mxu3 }
 0x16f   :  { %v4245_v33 = vadd.f32 %v1576_v32, %v3831_v15 }
 0x170   :  { %v1810_v36 = vpop.f32.mrf.mxu2  ;;  %v1647_v41 = vpop.f32.mrf.mxu0 }
 0x171   :  { %v4247_v40 = vadd.f32 %v1810_v36, %v1728_v22  ;;  %v1648_v51 = vadd.f32 %v1647_v41, %v4122_v31  ;;  %v1730_v15 = vpop.f32.mrf.mxu1  ;;  %v300_v31 = vld [vmem:[%s5082_s1 + $0x390] sm:$0xff]  ;;  %v298_v36 = vld [vmem:[%s5082_s1 + $0x380] sm:$0xff] }
 0x172   :  { %v417_v6 = vpack.c.bf16 %v301_v34, %v300_v31  ;;  %v332_v22 = vld [vmem:[%s5082_s1 + $0x490] sm:$0xff] }
 0x173   :  { %v1731_v59 = vadd.f32 %v1730_v15, %v1648_v51  ;;  %1618 = vmatmul.bf16.gmra.mxu3 %v2791_v39  ;;  %1686 = vmatmul.bf16.gmra.mxu0 %v2663_v56  ;;  %v433_v17 = vpack.c.bf16 %v333_v27, %v332_v22  ;;  %v299_v39 = vld [vmem:[%s5082_s1 + $0x388] sm:$0xff]  ;;  %v2711_v15 = vor.u32 %v2991_v45, %v2708_v10 }
 0x174   :  { %1769 = vmatmul.bf16.gmra.mxu1 %v2667_v35  ;;  %1888 = vmatpush.bf16.msra.mxu3 %v417_v6  ;;  %v416_v47 = vpack.c.bf16 %v299_v39, %v298_v36 }
 0x175   :  { %1852 = vmatmul.bf16.gmra.mxu2 %v2671_v58  ;;  %v2707_v58 = vor.u32 %v2996_v23, %v2706_v4  ;;  %2054 = vmatpush.bf16.msra.mxu1 %v433_v17  ;;  %v2750_v4 = vld [vmem:[%s5083_s0 + $0x3d8] sm:$0xf] }
 0x176   :  { %v1579_v28 = vpop.f32.mrf.mxu3 }
 0x177   :  { %v4257_v7 = vadd.f32 %v1579_v28, %v3842_v26  ;;  %v3023_v26 = vld [vmem:[%s5083_s0 + $0x484] sm:$0xf] }
 0x178   :  { %v1813_v57 = vpop.f32.mrf.mxu2  ;;  %v1649_v62 = vpop.f32.mrf.mxu0  ;;  %v2835_v35 = vor.u32 %v3023_v26, %v2832_v14  ;;  %1889 = vmatpush.bf16.msra.mxu3 %v416_v47 }
 0x179   :  { %v4259_v54 = vadd.f32 %v1813_v57, %v1731_v59  ;;  %v1650_v2 = vadd.f32 %v1649_v62, %v4157_v60  ;;  %v1732_v3 = vpop.f32.mrf.mxu1  ;;  %v316_v60 = vld [vmem:[%s5082_s1 + $0x410] sm:$0xff] }
 0x17a   :  { %v425_v61 = vpack.c.bf16 %v317_v0, %v316_v60  ;;  %v2758_v60 = vld [vmem:[%s5083_s0 + $0x3e0] sm:$0xf]  ;;  %v3008_v0 = vld [vmem:[%s5083_s0 + $0x408] sm:$0xf0] }
 0x17b   :  { %v1733_v18 = vadd.f32 %v1732_v3, %v1650_v2  ;;  %v2759_v17 = vor.u32 %v3008_v0, %v2758_v60 }
 0x17c   :  { %1971 = vmatpush.bf16.msra.mxu0 %v425_v61 }
 0x17e   :  { %v1581_v32 = vpop.f32.mrf.mxu3 }
 0x17f   :  { %v4311_v56 = vadd.f32 %v1581_v32, %v3889_v25 }
 0x180   :  { %v1815_v41 = vpop.f32.mrf.mxu2  ;;  %v1652_v51 = vpop.f32.mrf.mxu0 }
 0x181   :  { %v4313_v20 = vadd.f32 %v1815_v41, %v1733_v18  ;;  %v1653_v59 = vadd.f32 %v1652_v51, %v4162_v21  ;;  %v1735_v28 = vpop.f32.mrf.mxu1  ;;  %v3057_v21 = vld [vmem:[%s5083_s0 + $0x4d8] sm:$0xff]  ;;  %v346_v41 = vld [vmem:[%s5082_s1 + $0x500] sm:$0xff] }
 0x182   :  { %v932_v26 = vunpack.c.h.b16 %v3057_v21  ;;  %v3002_v18 = vld [vmem:[%s5083_s0 + $0x3dc] sm:$0xf] }
 0x183   :  { %v1736_v57 = vadd.f32 %v1735_v28, %v1653_v59  ;;  %1623 = vmatmul.bf16.gmra.mxu3 %v2835_v35  ;;  %1691 = vmatmul.bf16.gmra.mxu0 %v2707_v58  ;;  %v2794_v28 = vld [vmem:[%s5083_s0 + $0x430] sm:$0xf] }
 0x184   :  { %1774 = vmatmul.bf16.gmra.mxu1 %v2711_v15  ;;  %v1097_v61 = vpack.c.b16 %v932_v26, %v932_v26  ;;  %v331_v26 = vld [vmem:[%s5082_s1 + $0x488] sm:$0xff] }
 0x185   :  { %1857 = vmatmul.bf16.gmra.mxu2 %v2715_v55 }
 0x186   :  { %v1584_v25 = vpop.f32.mrf.mxu3 }
 0x187   :  { %v4317_v62 = vadd.f32 %v1584_v25, %v3894_v43  ;;  %v3007_v43 = vld [vmem:[%s5083_s0 + $0x400] sm:$0xf0] }
 0x188   :  { %v1818_v31 = vpop.f32.mrf.mxu2  ;;  %v1654_v2 = vpop.f32.mrf.mxu0  ;;  %v2751_v27 = vor.u32 %v3007_v43, %v2750_v4  ;;  %v2802_v4 = vld [vmem:[%s5083_s0 + $0x438] sm:$0xf]  ;;  %v3019_v43 = vld [vmem:[%s5083_s0 + $0x460] sm:$0xf0] }
 0x189   :  { %v4319_v34 = vadd.f32 %v1818_v31, %v1736_v57  ;;  %v1655_v3 = vadd.f32 %v1654_v2, %v4197_v42  ;;  %v1737_v6 = vpop.f32.mrf.mxu1  ;;  %v2752_v42 = vld [vmem:[%s5083_s0 + $0x404] sm:$0xf0]  ;;  %v3018_v57 = vld [vmem:[%s5083_s0 + $0x458] sm:$0xf0]  ;;  %v314_v31 = vld [vmem:[%s5082_s1 + $0x400] sm:$0xff] }
 0x18a   :  { %v2755_v29 = vor.u32 %v3002_v18, %v2752_v42  ;;  %v330_v2 = vld [vmem:[%s5082_s1 + $0x480] sm:$0xff] }
 0x18b   :  { %v1738_v14 = vadd.f32 %v1737_v6, %v1655_v3  ;;  %v2882_v3 = vld [vmem:[%s5083_s0 + $0x1c] sm:$0xf]  ;;  %v2276_v6 = vld [vmem:[%s5083_s0 + $0x44] sm:$0xf0]  ;;  %v432_v18 = vpack.c.bf16 %v331_v26, %v330_v2 }
 0x18d   :  { %2055 = vmatpush.bf16.msra.mxu1 %v432_v18 }
 0x18e   :  { %v1586_v22 = vpop.f32.mrf.mxu3 }
 0x18f   :  { %v4344_v23 = vadd.f32 %v1586_v22, %v3920_v30  ;;  %v347_v30 = vld [vmem:[%s5082_s1 + $0x508] sm:$0xff]  ;;  %v2795_v22 = vor.u32 %v3018_v57, %v2794_v28  ;;  %v2840_v28 = vld [vmem:[%s5083_s0 + $0x4b4] sm:$0xf0]  ;;  %v2846_v57 = vld [vmem:[%s5083_s0 + $0x490] sm:$0xf] }
 0x190   :  { %v1820_v45 = vpop.f32.mrf.mxu2  ;;  %v1657_v44 = vpop.f32.mrf.mxu0  ;;  %v440_v35 = vpack.c.bf16 %v347_v30, %v346_v41 }
 0x191   :  { %v4346_v10 = vadd.f32 %v1820_v45, %v1738_v14  ;;  %v1658_v32 = vadd.f32 %v1657_v44, %v4215_v12  ;;  %v1740_v36 = vpop.f32.mrf.mxu1  ;;  %v2796_v14 = vld [vmem:[%s5083_s0 + $0x45c] sm:$0xf0]  ;;  %v2279_v45 = vor.u32 %v2882_v3, %v2276_v6 }
 0x192   :  { %2138 = vmatpush.bf16.msra.mxu2 %v440_v35 }
 0x193   :  { %v1741_v39 = vadd.f32 %v1740_v36, %v1658_v32  ;;  %1628 = vmatmul.bf16.gmra.mxu3 %v1097_v61  ;;  %1696 = vmatmul.bf16.gmra.mxu0 %v2751_v27 }
 0x194   :  { %1779 = vmatmul.bf16.gmra.mxu1 %v2755_v29  ;;  %v2803_v29 = vor.u32 %v3019_v43, %v2802_v4 }
 0x195   :  { %1862 = vmatmul.bf16.gmra.mxu2 %v2759_v17 }
 0x196   :  { %v1589_v58 = vpop.f32.mrf.mxu3 }
 0x197   :  { %v4356_v47 = vadd.f32 %v1589_v58, %v3943_v49  ;;  %v3013_v49 = vld [vmem:[%s5083_s0 + $0x434] sm:$0xf] }
 0x198   :  { %v1823_v12 = vpop.f32.mrf.mxu2  ;;  %v1659_v15 = vpop.f32.mrf.mxu0  ;;  %v2799_v44 = vor.u32 %v3013_v49, %v2796_v14 }
 0x199   :  { %v4358_v51 = vadd.f32 %v1823_v12, %v1741_v39  ;;  %v1660_v55 = vadd.f32 %v1659_v15, %v4245_v33  ;;  %v1742_v59 = vpop.f32.mrf.mxu1  ;;  %v315_v33 = vld [vmem:[%s5082_s1 + $0x408] sm:$0xff] }
 0x19a   :  { %v424_v21 = vpack.c.bf16 %v315_v33, %v314_v31 }
 0x19b   :  { %v1743_v25 = vadd.f32 %v1742_v59, %v1660_v55  ;;  %v3029_v55 = vld [vmem:[%s5083_s0 + $0x4b0] sm:$0xf0] }
 0x19c   :  { %1972 = vmatpush.bf16.msra.mxu0 %v424_v21  ;;  %v2893_v59 = vld [vmem:[%s5083_s0 + $0x74] sm:$0xf] }
 0x19e   :  { %v1591_v42 = vpop.f32.mrf.mxu3 }
 0x19f   :  { %v4398_v60 = vadd.f32 %v1591_v42, %v3978_v13 }
 0x1a0   :  { %v1825_v0 = vpop.f32.mrf.mxu2  ;;  %v1662_v27 = vpop.f32.mrf.mxu0 }
 0x1a1   :  { %v4400_v61 = vadd.f32 %v1825_v0, %v1743_v25  ;;  %v1663_v17 = vadd.f32 %v1662_v27, %v4257_v7  ;;  %v1745_v32 = vpop.f32.mrf.mxu1  ;;  %v2838_v7 = vld [vmem:[%s5083_s0 + $0x488] sm:$0xf]  ;;  %v3030_v25 = vld [vmem:[%s5083_s0 + $0x4b8] sm:$0xf0]  ;;  %v182_v27 = vld [vmem:[%s5083_s0 + $0x4e0] sm:$0xff] }
 0x1a2   :  { %v2839_v2 = vor.u32 %v3029_v55, %v2838_v7  ;;  %v2847_v14 = vor.u32 %v3030_v25, %v2846_v57 }
 0x1a3   :  { %v1746_v36 = vadd.f32 %v1745_v32, %v1663_v17  ;;  %1701 = vmatmul.bf16.gmra.mxu0 %v2795_v22  ;;  %1890 = vmatmul.bf16.vlgmr.msra.gmra.mxu3 %v2279_v45  ;;  %v933_v32 = vunpack.c.l.b16 %v182_v27 }
 0x1a4   :  { %1784 = vmatmul.bf16.gmra.mxu1 %v2799_v44 }
 0x1a5   :  { %1867 = vmatmul.bf16.gmra.mxu2 %v2803_v29  ;;  %v4451_v29 = vld [vmem:[%s5083_s0 + $0x4e8] sm:$0xff] }
 0x1a6   :  { %v1594_v39 = vpop.f32.mrf.mxu3 }
 0x1a7   :  { %v4404_v13 = vadd.f32 %v1594_v39, %v3983_v52  ;;  %v3024_v52 = vld [vmem:[%s5083_s0 + $0x48c] sm:$0xf] }
 0x1a8   :  { %v1828_v41 = vpop.f32.mrf.mxu2  ;;  %v1664_v35 = vpop.f32.mrf.mxu0  ;;  %v2843_v26 = vor.u32 %v3024_v52, %v2840_v28  ;;  %v2904_v39 = vld [vmem:[%s5083_s0 + $0xcc] sm:$0xf] }
 0x1a9   :  { %v4406_v30 = vadd.f32 %v1828_v41, %v1746_v36  ;;  %v1665_v58 = vadd.f32 %v1664_v35, %v4311_v56  ;;  %v1747_v12 = vpop.f32.mrf.mxu1  ;;  %v2320_v56 = vld [vmem:[%s5083_s0 + $0x9c] sm:$0xf0]  ;;  %v935_v36 = vunpack.c.l.b16 %v4451_v29  ;;  %v2364_v41 = vld [vmem:[%s5083_s0 + $0xf4] sm:$0xf0] }
 0x1aa   :  { %v2323_v3 = vor.u32 %v2893_v59, %v2320_v56 }
 0x1ab   :  { %v1748_v15 = vadd.f32 %v1747_v12, %v1665_v58  ;;  %v1098_v12 = vpack.c.b16 %v933_v32, %v933_v32  ;;  %v1100_v59 = vpack.c.b16 %v935_v36, %v935_v36 }
 0x1ae   :  { %v1596_v49 = vpop.f32.mrf.mxu3 }
 0x1af   :  { %v4434_v31 = vadd.f32 %v1596_v49, %v4018_v50 }
 0x1b0   :  { %v1830_v33 = vpop.f32.mrf.mxu2  ;;  %v1667_v21 = vpop.f32.mrf.mxu0 }
 0x1b1   :  { %v4436_v6 = vadd.f32 %v1830_v33, %v1748_v15  ;;  %v1668_v4 = vadd.f32 %v1667_v21, %v4317_v62  ;;  %v1750_v43 = vpop.f32.mrf.mxu1  ;;  %v2367_v15 = vor.u32 %v2904_v39, %v2364_v41 }
 0x1b3   :  { %v1751_v18 = vadd.f32 %v1750_v43, %v1668_v4  ;;  %1706 = vmatmul.bf16.gmra.mxu0 %v2839_v2  ;;  %1895 = vmatmul.bf16.gmra.mxu3 %v2323_v3  ;;  %v2888_v4 = vld [vmem:[%s5083_s0 + $0x48] sm:$0xf0]  ;;  %v2284_v43 = vld [vmem:[%s5083_s0 + $0x4c] sm:$0xf0] }
 0x1b4   :  { %1789 = vmatmul.bf16.gmra.mxu1 %v2843_v26 }
 0x1b5   :  { %1872 = vmatmul.bf16.gmra.mxu2 %v2847_v14  ;;  %v2408_v14 = vld [vmem:[%s5083_s0 + $0x14c] sm:$0xf0] }
 0x1b6   :  { %v1599_v42 = vpop.f32.mrf.mxu3 }
 0x1b7   :  { %v4440_v50 = vadd.f32 %v1599_v42, %v4035_v5  ;;  %v934_v5 = vunpack.c.h.b16 %v182_v27  ;;  %v2889_v42 = vld [vmem:[%s5083_s0 + $0x50] sm:$0xf0] }
 0x1b8   :  { %v1833_v0 = vpop.f32.mrf.mxu2  ;;  %v1669_v45 = vpop.f32.mrf.mxu0 }
 0x1b9   :  { %v4442_v22 = vadd.f32 %v1833_v0, %v1751_v18  ;;  %v1670_v62 = vadd.f32 %v1669_v45, %v4344_v23  ;;  %v1752_v44 = vpop.f32.mrf.mxu1  ;;  %v1099_v52 = vpack.c.b16 %v934_v5, %v934_v5  ;;  %v2290_v18 = vld [vmem:[%s5083_s0 + $0x28] sm:$0xf] }
 0x1ba   :  { %v2291_v36 = vor.u32 %v2889_v42, %v2290_v18 }
 0x1bb   :  { %v1753_v17 = vadd.f32 %v1752_v44, %v1670_v62 }
 0x1be   :  { %v1601_v23 = vpop.f32.mrf.mxu3 }
 0x1bf   :  { %v4461_v35 = vadd.f32 %v1601_v23, %v4067_v37 }
 0x1c0   :  { %v1835_v58 = vpop.f32.mrf.mxu2  ;;  %v1672_v55 = vpop.f32.mrf.mxu0 }
 0x1c1   :  { %v4463_v7 = vadd.f32 %v1835_v58, %v1753_v17  ;;  %v1673_v56 = vadd.f32 %v1672_v55, %v4356_v47  ;;  %v1755_v28 = vpop.f32.mrf.mxu1  ;;  %v2915_v47 = vld [vmem:[%s5083_s0 + $0x124] sm:$0xf] }
 0x1c2   :  { %v2411_v62 = vor.u32 %v2915_v47, %v2408_v14 }
 0x1c3   :  { %v1756_v57 = vadd.f32 %v1755_v28, %v1673_v56  ;;  %1711 = vmatmul.bf16.gmra.mxu0 %v1098_v12  ;;  %1900 = vmatmul.bf16.gmra.mxu3 %v2367_v15  ;;  %v2926_v56 = vld [vmem:[%s5083_s0 + $0x17c] sm:$0xf]  ;;  %v2452_v28 = vld [vmem:[%s5083_s0 + $0x1a4] sm:$0xf0] }
 0x1c4   :  { %1794 = vmatmul.bf16.gmra.mxu1 %v1099_v52  ;;  %v2455_v47 = vor.u32 %v2926_v56, %v2452_v28 }
 0x1c5   :  { %1877 = vmatmul.bf16.gmra.mxu2 %v1100_v59 }
 0x1c6   :  { %v1604_v25 = vpop.f32.mrf.mxu3 }
 0x1c7   :  { %v4467_v37 = vadd.f32 %v1604_v25, %v4072_v46  ;;  %v2282_v46 = vld [vmem:[%s5083_s0 + $0x20] sm:$0xf]  ;;  %v2328_v25 = vld [vmem:[%s5083_s0 + $0xa4] sm:$0xf0] }
 0x1c8   :  { %v1838_v49 = vpop.f32.mrf.mxu2  ;;  %v1674_v2 = vpop.f32.mrf.mxu0  ;;  %v2283_v44 = vor.u32 %v2888_v4, %v2282_v46 }
 0x1c9   :  { %v4469_v33 = vadd.f32 %v1838_v49, %v1756_v57  ;;  %v1675_v3 = vadd.f32 %v1674_v2, %v4398_v60  ;;  %v1757_v21 = vpop.f32.mrf.mxu1  ;;  %v2883_v60 = vld [vmem:[%s5083_s0 + $0x24] sm:$0xf]  ;;  %v2334_v49 = vld [vmem:[%s5083_s0 + $0x80] sm:$0xf]  ;;  %v2900_v2 = vld [vmem:[%s5083_s0 + $0xa8] sm:$0xf0] }
 0x1ca   :  { %v2287_v5 = vor.u32 %v2883_v60, %v2284_v43  ;;  %v2899_v57 = vld [vmem:[%s5083_s0 + $0xa0] sm:$0xf0]  ;;  %v2335_v43 = vor.u32 %v2900_v2, %v2334_v49 }
 0x1cb   :  { %v1758_v26 = vadd.f32 %v1757_v21, %v1675_v3 }
 0x1ce   :  { %v1606_v0 = vpop.f32.mrf.mxu3 }
 0x1cf   :  { %v4497_v45 = vadd.f32 %v1606_v0, %v4107_v19 }
 0x1d0   :  { %v1840_v27 = vpop.f32.mrf.mxu2  ;;  %v1677_v32 = vpop.f32.mrf.mxu0 }
 0x1d1   :  { %v4499_v17 = vadd.f32 %v1840_v27, %v1758_v26  ;;  %v1678_v39 = vadd.f32 %v1677_v32, %v4404_v13  ;;  %v1760_v41 = vpop.f32.mrf.mxu1 }
 0x1d3   :  { %v1761_v23 = vadd.f32 %v1760_v41, %v1678_v39  ;;  %1905 = vmatmul.bf16.gmra.mxu3 %v2411_v62  ;;  %1973 = vmatmul.bf16.vlgmr.msra.gmra.mxu0 %v2283_v44  ;;  %v2496_v41 = vld [vmem:[%s5083_s0 + $0x1fc] sm:$0xf0] }
 0x1d4   :  { %2056 = vmatmul.bf16.vlgmr.msra.gmra.mxu1 %v2287_v5 }
 0x1d5   :  { %2864 = vmatmul.msk.bf16.vlgmr.msra.gmra.mxu2 %vm1255_vm0, %v2291_v36 }
 0x1d6   :  { %v1609_v19 = vpop.f32.mrf.mxu3 }
 0x1d7   :  { %v4504_v58 = vadd.f32 %v1609_v19, %v4124_v38  ;;  %v2326_v38 = vld [vmem:[%s5083_s0 + $0x78] sm:$0xf]  ;;  %v2372_v19 = vld [vmem:[%s5083_s0 + $0xfc] sm:$0xf0] }
 0x1d8   :  { %v1843_v12 = vpop.f32.mrf.mxu2  ;;  %v1679_v55 = vpop.f32.mrf.mxu0  ;;  %v2327_v14 = vor.u32 %v2899_v57, %v2326_v38 }
 0x1d9   :  { %v4506_v15 = vadd.f32 %v1843_v12, %v1761_v23  ;;  %v1680_v52 = vadd.f32 %v1679_v55, %v4434_v31  ;;  %v1762_v59 = vpop.f32.mrf.mxu1  ;;  %v2894_v31 = vld [vmem:[%s5083_s0 + $0x7c] sm:$0xf]  ;;  %v2378_v12 = vld [vmem:[%s5083_s0 + $0xd8] sm:$0xf]  ;;  %v2911_v55 = vld [vmem:[%s5083_s0 + $0x100] sm:$0xf0] }
 0x1da   :  { %v2331_v60 = vor.u32 %v2894_v31, %v2328_v25  ;;  %v2910_v23 = vld [vmem:[%s5083_s0 + $0xf8] sm:$0xf0]  ;;  %v2379_v25 = vor.u32 %v2911_v55, %v2378_v12 }
 0x1db   :  { %v1763_v13 = vadd.f32 %v1762_v59, %v1680_v52 }
 0x1de   :  { %v1611_v3 = vpop.f32.mrf.mxu3 }
 0x1df   :  { %v4534_v21 = vadd.f32 %v1611_v3, %v4159_v63 }
 0x1e0   :  { %v1845_v26 = vpop.f32.mrf.mxu2  ;;  %v1682_v4 = vpop.f32.mrf.mxu0 }
 0x1e1   :  { %v4536_v46 = vadd.f32 %v1845_v26, %v1763_v13  ;;  %v1683_v18 = vadd.f32 %v1682_v4, %v4440_v50  ;;  %v1765_v42 = vpop.f32.mrf.mxu1  ;;  %v2937_v50 = vld [vmem:[%s5083_s0 + $0x1d4] sm:$0xf] }
 0x1e2   :  { %v2499_v56 = vor.u32 %v2937_v50, %v2496_v41 }
 0x1e3   :  { %v1766_v0 = vadd.f32 %v1765_v42, %v1683_v18  ;;  %1910 = vmatmul.bf16.gmra.mxu3 %v2455_v47  ;;  %1978 = vmatmul.bf16.gmra.mxu0 %v2327_v14  ;;  %v2540_v42 = vld [vmem:[%s5083_s0 + $0x254] sm:$0xf0] }
 0x1e4   :  { %2061 = vmatmul.bf16.gmra.mxu1 %v2331_v60 }
 0x1e5   :  { %2865 = vmatmul.msk.bf16.gmra.mxu2 %vm1255_vm0, %v2335_v43 }
 0x1e6   :  { %v1614_v27 = vpop.f32.mrf.mxu3 }
 0x1e7   :  { %v4541_v63 = vadd.f32 %v1614_v27, %v4164_v11  ;;  %v2370_v11 = vld [vmem:[%s5083_s0 + $0xd0] sm:$0xf]  ;;  %v2416_v27 = vld [vmem:[%s5083_s0 + $0x154] sm:$0xf0] }
 0x1e8   :  { %v1848_v62 = vpop.f32.mrf.mxu2  ;;  %v1684_v32 = vpop.f32.mrf.mxu0  ;;  %v2371_v28 = vor.u32 %v2910_v23, %v2370_v11 }
 0x1e9   :  { %v4543_v44 = vadd.f32 %v1848_v62, %v1766_v0  ;;  %v1685_v5 = vadd.f32 %v1684_v32, %v4461_v35  ;;  %v1767_v36 = vpop.f32.mrf.mxu1  ;;  %v2905_v35 = vld [vmem:[%s5083_s0 + $0xd4] sm:$0xf]  ;;  %v2422_v62 = vld [vmem:[%s5083_s0 + $0x130] sm:$0xf]  ;;  %v2922_v32 = vld [vmem:[%s5083_s0 + $0x158] sm:$0xf0] }
 0x1ea   :  { %v2375_v31 = vor.u32 %v2905_v35, %v2372_v19  ;;  %v2921_v0 = vld [vmem:[%s5083_s0 + $0x150] sm:$0xf0]  ;;  %v2423_v19 = vor.u32 %v2922_v32, %v2422_v62 }
 0x1eb   :  { %v1768_v39 = vadd.f32 %v1767_v36, %v1685_v5 }
 0x1ee   :  { %v1616_v52 = vpop.f32.mrf.mxu3 }
 0x1ef   :  { %v4571_v59 = vadd.f32 %v1616_v52, %v4199_v16 }
 0x1f0   :  { %v1850_v13 = vpop.f32.mrf.mxu2  ;;  %v1687_v57 = vpop.f32.mrf.mxu0 }
 0x1f1   :  { %v4573_v38 = vadd.f32 %v1850_v13, %v1768_v39  ;;  %v1688_v49 = vadd.f32 %v1687_v57, %v4467_v37  ;;  %v1770_v2 = vpop.f32.mrf.mxu1  ;;  %v2948_v37 = vld [vmem:[%s5083_s0 + $0x22c] sm:$0xf] }
 0x1f2   :  { %v2543_v50 = vor.u32 %v2948_v37, %v2540_v42 }
 0x1f3   :  { %v1771_v3 = vadd.f32 %v1770_v2, %v1688_v49  ;;  %1915 = vmatmul.bf16.gmra.mxu3 %v2499_v56  ;;  %1983 = vmatmul.bf16.gmra.mxu0 %v2371_v28  ;;  %v2584_v2 = vld [vmem:[%s5083_s0 + $0x2ac] sm:$0xf0] }
 0x1f4   :  { %2066 = vmatmul.bf16.gmra.mxu1 %v2375_v31 }
 0x1f5   :  { %2866 = vmatmul.msk.bf16.gmra.mxu2 %vm1255_vm0, %v2379_v25 }
 0x1f6   :  { %v1619_v26 = vpop.f32.mrf.mxu3 }
 0x1f7   :  { %v4578_v16 = vadd.f32 %v1619_v26, %v3941_v48  ;;  %v2414_v48 = vld [vmem:[%s5083_s0 + $0x128] sm:$0xf]  ;;  %v2460_v26 = vld [vmem:[%s5083_s0 + $0x1ac] sm:$0xf0] }
 0x1f8   :  { %v1853_v47 = vpop.f32.mrf.mxu2  ;;  %v1689_v4 = vpop.f32.mrf.mxu0  ;;  %v2415_v41 = vor.u32 %v2921_v0, %v2414_v48 }
 0x1f9   :  { %v4580_v14 = vadd.f32 %v1853_v47, %v1771_v3  ;;  %v1690_v60 = vadd.f32 %v1689_v4, %v4497_v45  ;;  %v1772_v43 = vpop.f32.mrf.mxu1  ;;  %v2916_v45 = vld [vmem:[%s5083_s0 + $0x12c] sm:$0xf]  ;;  %v2466_v47 = vld [vmem:[%s5083_s0 + $0x188] sm:$0xf]  ;;  %v2933_v4 = vld [vmem:[%s5083_s0 + $0x1b0] sm:$0xf0] }
 0x1fa   :  { %v2419_v35 = vor.u32 %v2916_v45, %v2416_v27  ;;  %v2932_v3 = vld [vmem:[%s5083_s0 + $0x1a8] sm:$0xf0]  ;;  %v2467_v27 = vor.u32 %v2933_v4, %v2466_v47 }
 0x1fb   :  { %v1773_v18 = vadd.f32 %v1772_v43, %v1690_v60 }
 0x1fe   :  { %v1621_v5 = vpop.f32.mrf.mxu3 }
 0x1ff   :  { %v4608_v36 = vadd.f32 %v1621_v5, %v3976_v9 }
 0x200   :  { %v1855_v39 = vpop.f32.mrf.mxu2  ;;  %v1692_v23 = vpop.f32.mrf.mxu0 }
 0x201   :  { %v4610_v11 = vadd.f32 %v1855_v39, %v1773_v18  ;;  %v1693_v12 = vadd.f32 %v1692_v23, %v4504_v58  ;;  %v1775_v55 = vpop.f32.mrf.mxu1  ;;  %v2959_v58 = vld [vmem:[%s5083_s0 + $0x284] sm:$0xf] }
 0x202   :  { %v2587_v37 = vor.u32 %v2959_v58, %v2584_v2 }
 0x203   :  { %v1776_v52 = vadd.f32 %v1775_v55, %v1693_v12  ;;  %1920 = vmatmul.bf16.gmra.mxu3 %v2543_v50  ;;  %1988 = vmatmul.bf16.gmra.mxu0 %v2415_v41  ;;  %v2628_v55 = vld [vmem:[%s5083_s0 + $0x304] sm:$0xf0] }
 0x204   :  { %2071 = vmatmul.bf16.gmra.mxu1 %v2419_v35 }
 0x205   :  { %2867 = vmatmul.msk.bf16.gmra.mxu2 %vm1255_vm0, %v2423_v19 }
 0x206   :  { %v1624_v13 = vpop.f32.mrf.mxu3 }
 0x207   :  { %v4615_v9 = vadd.f32 %v1624_v13, %v3981_v8  ;;  %v2458_v8 = vld [vmem:[%s5083_s0 + $0x180] sm:$0xf]  ;;  %v2504_v13 = vld [vmem:[%s5083_s0 + $0x204] sm:$0xf0] }
 0x208   :  { %v1858_v56 = vpop.f32.mrf.mxu2  ;;  %v1694_v57 = vpop.f32.mrf.mxu0  ;;  %v2459_v42 = vor.u32 %v2932_v3, %v2458_v8 }
 0x209   :  { %v4617_v28 = vadd.f32 %v1858_v56, %v1776_v52  ;;  %v1695_v31 = vadd.f32 %v1694_v57, %v4534_v21  ;;  %v1777_v25 = vpop.f32.mrf.mxu1  ;;  %v2927_v21 = vld [vmem:[%s5083_s0 + $0x184] sm:$0xf]  ;;  %v2510_v56 = vld [vmem:[%s5083_s0 + $0x1e0] sm:$0xf]  ;;  %v2944_v57 = vld [vmem:[%s5083_s0 + $0x208] sm:$0xf0] }
 0x20a   :  { %v2463_v45 = vor.u32 %v2927_v21, %v2460_v26  ;;  %v2943_v52 = vld [vmem:[%s5083_s0 + $0x200] sm:$0xf0]  ;;  %v2511_v21 = vor.u32 %v2944_v57, %v2510_v56 }
 0x20b   :  { %v1778_v49 = vadd.f32 %v1777_v25, %v1695_v31 }
 0x20e   :  { %v1626_v60 = vpop.f32.mrf.mxu3 }
 0x20f   :  { %v4645_v43 = vadd.f32 %v1626_v60, %v4016_v1 }
 0x210   :  { %v1860_v18 = vpop.f32.mrf.mxu2  ;;  %v1697_v0 = vpop.f32.mrf.mxu0 }
 0x211   :  { %v4647_v48 = vadd.f32 %v1860_v18, %v1778_v49  ;;  %v1698_v62 = vadd.f32 %v1697_v0, %v4541_v63  ;;  %v1780_v32 = vpop.f32.mrf.mxu1  ;;  %v2970_v63 = vld [vmem:[%s5083_s0 + $0x2dc] sm:$0xf] }
 0x212   :  { %v2631_v49 = vor.u32 %v2970_v63, %v2628_v55 }
 0x213   :  { %v1781_v5 = vadd.f32 %v1780_v32, %v1698_v62  ;;  %1925 = vmatmul.bf16.gmra.mxu3 %v2587_v37  ;;  %1993 = vmatmul.bf16.gmra.mxu0 %v2459_v42  ;;  %v2672_v62 = vld [vmem:[%s5083_s0 + $0x35c] sm:$0xf0]  ;;  %v2546_v32 = vld [vmem:[%s5083_s0 + $0x230] sm:$0xf] }
 0x214   :  { %2076 = vmatmul.bf16.gmra.mxu1 %v2463_v45 }
 0x215   :  { %2868 = vmatmul.msk.bf16.gmra.mxu2 %vm1255_vm0, %v2467_v27 }
 0x216   :  { %v1629_v39 = vpop.f32.mrf.mxu3 }
 0x217   :  { %v4652_v1 = vadd.f32 %v1629_v39, %v4033_v24  ;;  %v2502_v24 = vld [vmem:[%s5083_s0 + $0x1d8] sm:$0xf]  ;;  %v2548_v39 = vld [vmem:[%s5083_s0 + $0x25c] sm:$0xf0] }
 0x218   :  { %v1863_v50 = vpop.f32.mrf.mxu2  ;;  %v1699_v23 = vpop.f32.mrf.mxu0  ;;  %v2503_v58 = vor.u32 %v2943_v52, %v2502_v24 }
 0x219   :  { %v4654_v41 = vadd.f32 %v1863_v50, %v1781_v5  ;;  %v1700_v35 = vadd.f32 %v1699_v23, %v4571_v59  ;;  %v1782_v19 = vpop.f32.mrf.mxu1  ;;  %v2938_v59 = vld [vmem:[%s5083_s0 + $0x1dc] sm:$0xf]  ;;  %v2554_v50 = vld [vmem:[%s5083_s0 + $0x238] sm:$0xf]  ;;  %v2955_v23 = vld [vmem:[%s5083_s0 + $0x260] sm:$0xf0] }
 0x21a   :  { %v2507_v3 = vor.u32 %v2938_v59, %v2504_v13  ;;  %v2954_v5 = vld [vmem:[%s5083_s0 + $0x258] sm:$0xf0]  ;;  %v2555_v59 = vor.u32 %v2955_v23, %v2554_v50 }
 0x21b   :  { %v1783_v12 = vadd.f32 %v1782_v19, %v1700_v35  ;;  %v2547_v63 = vor.u32 %v2954_v5, %v2546_v32 }
 0x21e   :  { %v1631_v31 = vpop.f32.mrf.mxu3 }
 0x220   :  { %v1865_v25 = vpop.f32.mrf.mxu2  ;;  %v1702_v8 = vpop.f32.mrf.mxu0 }
 0x221   :  { %v4681_v2 = vadd.f32 %v1865_v25, %v1783_v12  ;;  %v1703_v26 = vadd.f32 %v1702_v8, %v4578_v16  ;;  %v1785_v47 = vpop.f32.mrf.mxu1  ;;  %v2981_v16 = vld [vmem:[%s5083_s0 + $0x334] sm:$0xf] }
 0x222   :  { %v2675_v12 = vor.u32 %v2981_v16, %v2672_v62 }
 0x223   :  { %v1786_v4 = vadd.f32 %v1785_v47, %v1703_v26  ;;  %1930 = vmatmul.bf16.gmra.mxu3 %v2631_v49  ;;  %1998 = vmatmul.bf16.gmra.mxu0 %v2503_v58  ;;  %v2716_v26 = vld [vmem:[%s5083_s0 + $0x3b4] sm:$0xf0]  ;;  %v2590_v47 = vld [vmem:[%s5083_s0 + $0x288] sm:$0xf] }
 0x224   :  { %2081 = vmatmul.bf16.gmra.mxu1 %v2507_v3 }
 0x225   :  { %2869 = vmatmul.msk.bf16.gmra.mxu2 %vm1255_vm0, %v2511_v21 }
 0x226   :  { %v4685_v60 = vpop.f32.mrf.mxu3 }
 0x228   :  { %v1868_v18 = vpop.f32.mrf.mxu2  ;;  %v1704_v42 = vpop.f32.mrf.mxu0 }
 0x229   :  { %v4687_v37 = vadd.f32 %v1868_v18, %v1786_v4  ;;  %v1705_v0 = vadd.f32 %v1704_v42, %v4608_v36  ;;  %v1787_v45 = vpop.f32.mrf.mxu1  ;;  %v2949_v36 = vld [vmem:[%s5083_s0 + $0x234] sm:$0xf]  ;;  %v2592_v18 = vld [vmem:[%s5083_s0 + $0x2b4] sm:$0xf0]  ;;  %v2598_v42 = vld [vmem:[%s5083_s0 + $0x290] sm:$0xf] }
 0x22a   :  { %v2551_v52 = vor.u32 %v2949_v36, %v2548_v39  ;;  %v2965_v4 = vld [vmem:[%s5083_s0 + $0x2b0] sm:$0xf0] }
 0x22b   :  { %v1788_v27 = vadd.f32 %v1787_v45, %v1705_v0  ;;  %v2966_v0 = vld [vmem:[%s5083_s0 + $0x2b8] sm:$0xf0]  ;;  %v2591_v62 = vor.u32 %v2965_v4, %v2590_v47  ;;  %v1892_v4 = vadd.f32 %v4685_v60, %v4217_v53 }
 0x22c   :  { %v2599_v39 = vor.u32 %v2966_v0, %v2598_v42 }
 0x22e   :  { %v4714_v35 = vpop.f32.mrf.mxu3 }
 0x230   :  { %v1870_v19 = vpop.f32.mrf.mxu2  ;;  %v1707_v24 = vpop.f32.mrf.mxu0 }
 0x231   :  { %v4716_v55 = vadd.f32 %v1870_v19, %v1788_v27  ;;  %v1708_v13 = vadd.f32 %v1707_v24, %v4615_v9  ;;  %v1790_v56 = vpop.f32.mrf.mxu1  ;;  %v2992_v9 = vld [vmem:[%s5083_s0 + $0x38c] sm:$0xf] }
 0x232   :  { %v2719_v16 = vor.u32 %v2992_v9, %v2716_v26 }
 0x233   :  { %v1791_v57 = vadd.f32 %v1790_v56, %v1708_v13  ;;  %1935 = vmatmul.bf16.gmra.mxu3 %v2675_v12  ;;  %2003 = vmatmul.bf16.gmra.mxu0 %v2547_v63  ;;  %v3003_v13 = vld [vmem:[%s5083_s0 + $0x3e4] sm:$0xf]  ;;  %v2634_v56 = vld [vmem:[%s5083_s0 + $0x2e0] sm:$0xf] }
 0x234   :  { %2086 = vmatmul.bf16.gmra.mxu1 %v2551_v52 }
 0x235   :  { %2870 = vmatmul.msk.bf16.gmra.mxu2 %vm1255_vm0, %v2555_v59 }
 0x236   :  { %v4720_v31 = vpop.f32.mrf.mxu3 }
 0x238   :  { %v1873_v25 = vpop.f32.mrf.mxu2  ;;  %v1709_v58 = vpop.f32.mrf.mxu0 }
 0x239   :  { %v4722_v49 = vadd.f32 %v1873_v25, %v1791_v57  ;;  %v1710_v8 = vadd.f32 %v1709_v58, %v4645_v43  ;;  %v1792_v3 = vpop.f32.mrf.mxu1  ;;  %v2960_v43 = vld [vmem:[%s5083_s0 + $0x28c] sm:$0xf]  ;;  %v2971_v25 = vld [vmem:[%s5083_s0 + $0x2e4] sm:$0xf]  ;;  %v2636_v58 = vld [vmem:[%s5083_s0 + $0x30c] sm:$0xf0] }
 0x23a   :  { %v2595_v36 = vor.u32 %v2960_v43, %v2592_v18  ;;  %v2976_v57 = vld [vmem:[%s5083_s0 + $0x308] sm:$0xf0]  ;;  %v2639_v18 = vor.u32 %v2971_v25, %v2636_v58 }
 0x23b   :  { %v1793_v21 = vadd.f32 %v1792_v3, %v1710_v8  ;;  %v2642_v8 = vld [vmem:[%s5083_s0 + $0x2e8] sm:$0xf]  ;;  %v2977_v3 = vld [vmem:[%s5083_s0 + $0x310] sm:$0xf0]  ;;  %v2635_v47 = vor.u32 %v2976_v57, %v2634_v56 }
 0x23c   :  { %v2643_v42 = vor.u32 %v2977_v3, %v2642_v8  ;;  %v1897_v8 = vadd.f32 %v4720_v31, %v4259_v54 }
 0x23e   :  { %v4749_v45 = vpop.f32.mrf.mxu3 }
 0x23f   :  { %v1899_v31 = vadd.f32 %v4749_v45, %v4313_v20  ;;  %v2722_v20 = vld [vmem:[%s5083_s0 + $0x390] sm:$0xf]  ;;  %v2998_v45 = vld [vmem:[%s5083_s0 + $0x3b8] sm:$0xf0] }
 0x240   :  { %v1875_v27 = vpop.f32.mrf.mxu2  ;;  %v1712_v5 = vpop.f32.mrf.mxu0 }
 0x241   :  { %v4751_v32 = vadd.f32 %v1875_v27, %v1793_v21  ;;  %v1713_v50 = vadd.f32 %v1712_v5, %v4652_v1  ;;  %v1795_v23 = vpop.f32.mrf.mxu1  ;;  %v2760_v1 = vld [vmem:[%s5083_s0 + $0x40c] sm:$0xf0] }
 0x242   :  { %v2763_v26 = vor.u32 %v3003_v13, %v2760_v1  ;;  %v2988_v13 = vld [vmem:[%s5083_s0 + $0x368] sm:$0xf0] }
 0x243   :  { %v1796_v19 = vadd.f32 %v1795_v23, %v1713_v50  ;;  %1940 = vmatmul.bf16.gmra.mxu3 %v2719_v16  ;;  %2008 = vmatmul.bf16.gmra.mxu0 %v2591_v62  ;;  %v3014_v23 = vld [vmem:[%s5083_s0 + $0x43c] sm:$0xf] }
 0x244   :  { %2091 = vmatmul.bf16.gmra.mxu1 %v2595_v36  ;;  %v1894_v36 = vadd.f32 %v4714_v35, %v4247_v40  ;;  %v2678_v40 = vld [vmem:[%s5083_s0 + $0x338] sm:$0xf]  ;;  %v2987_v35 = vld [vmem:[%s5083_s0 + $0x360] sm:$0xf0] }
 0x245   :  { %2871 = vmatmul.msk.bf16.gmra.mxu2 %vm1255_vm0, %v2599_v39  ;;  %v2679_v58 = vor.u32 %v2987_v35, %v2678_v40 }
 0x246   :  { %v4755_v12 = vpop.f32.mrf.mxu3 }
 0x248   :  { %v1878_v63 = vpop.f32.mrf.mxu2  ;;  %v1714_v52 = vpop.f32.mrf.mxu0 }
 0x249   :  { %v4757_v24 = vadd.f32 %v1878_v63, %v1796_v19  ;;  %v1797_v59 = vpop.f32.mrf.mxu1  ;;  %v2804_v19 = vld [vmem:[%s5083_s0 + $0x464] sm:$0xf0]  ;;  %v2982_v63 = vld [vmem:[%s5083_s0 + $0x33c] sm:$0xf] }
 0x24a   :  { %v2680_v52 = vld [vmem:[%s5083_s0 + $0x364] sm:$0xf0]  ;;  %v2686_v59 = vld [vmem:[%s5083_s0 + $0x340] sm:$0xf]  ;;  %v2807_v25 = vor.u32 %v3014_v23, %v2804_v19  ;;  %v2999_v23 = vld [vmem:[%s5083_s0 + $0x3c0] sm:$0xf0] }
 0x24e   :  { %v4783_v21 = vpop.f32.mrf.mxu3 }
 0x250   :  { %v1880_v9 = vpop.f32.mrf.mxu2  ;;  %v1974_v43 = vpop.f32.mrf.mxu0 }
 0x251   :  { %v2057_v0 = vpop.f32.mrf.mxu1  ;;  %v1975_v27 = vadd.f32 %v1974_v43, %v1892_v4 }
 0x253   :  { %1945 = vmatmul.bf16.gmra.mxu3 %v2763_v26  ;;  %2013 = vmatmul.bf16.gmra.mxu0 %v2635_v47  ;;  %v2058_v16 = vadd.f32 %v2057_v0, %v1975_v27  ;;  %v2683_v26 = vor.u32 %v2982_v63, %v2680_v52  ;;  %v2687_v47 = vor.u32 %v2988_v13, %v2686_v59 }
 0x254   :  { %2096 = vmatmul.bf16.gmra.mxu1 %v2639_v18  ;;  %v2723_v52 = vor.u32 %v2998_v45, %v2722_v20  ;;  %v1902_v59 = vadd.f32 %v4755_v12, %v4319_v34  ;;  %v1904_v12 = vadd.f32 %v4783_v21, %v4346_v10  ;;  %v3004_v10 = vld [vmem:[%s5083_s0 + $0x3ec] sm:$0xf]  ;;  %v2768_v21 = vld [vmem:[%s5083_s0 + $0x414] sm:$0xf0] }
 0x255   :  { %2872 = vmatmul.msk.bf16.gmra.mxu2 %vm1255_vm0, %v2643_v42 }
 0x256   :  { %v4788_v62 = vpop.f32.mrf.mxu3 }
 0x257   :  { %v1907_v20 = vadd.f32 %v4788_v62, %v4358_v51 }
 0x258   :  { %v2140_v5 = vpop.f32.mrf.mxu2  ;;  %v1976_v53 = vpop.f32.mrf.mxu0 }
 0x259   :  { %v2141_v39 = vadd.f32 %v2140_v5, %v2058_v16  ;;  %v2059_v60 = vpop.f32.mrf.mxu1  ;;  %v1977_v50 = vadd.f32 %v1976_v53, %v1894_v36  ;;  %v3025_v36 = vld [vmem:[%s5083_s0 + $0x494] sm:$0xf] }
 0x25a   :  { %v2993_v53 = vld [vmem:[%s5083_s0 + $0x394] sm:$0xf] }
 0x25b   :  { %2215 = vst.msk [vmem:[%s5084_s2] sm:$0xff] %vm2214_vm1, %v2141_v39  ;;  %v2060_v1 = vadd.f32 %v2059_v60, %v1977_v50  ;;  %v2848_v39 = vld [vmem:[%s5083_s0 + $0x4bc] sm:$0xf0]  ;;  %v2730_v50 = vld [vmem:[%s5083_s0 + $0x398] sm:$0xf] }
 0x25c   :  { %v2724_v60 = vld [vmem:[%s5083_s0 + $0x3bc] sm:$0xf0]  ;;  %v2851_v63 = vor.u32 %v3025_v36, %v2848_v39 }
 0x25e   :  { %v4820_v56 = vpop.f32.mrf.mxu3 }
 0x25f   :  { %v1909_v62 = vadd.f32 %v4820_v56, %v4400_v61  ;;  %v3015_v61 = vld [vmem:[%s5083_s0 + $0x444] sm:$0xf]  ;;  %v2812_v56 = vld [vmem:[%s5083_s0 + $0x46c] sm:$0xf0] }
 0x260   :  { %v2142_v57 = vpop.f32.mrf.mxu2  ;;  %v1979_v9 = vpop.f32.mrf.mxu0 }
 0x261   :  { %v2143_v3 = vadd.f32 %v2142_v57, %v2060_v1  ;;  %v2062_v4 = vpop.f32.mrf.mxu1  ;;  %v1980_v43 = vadd.f32 %v1979_v9, %v1897_v8  ;;  %v2727_v57 = vor.u32 %v2993_v53, %v2724_v60  ;;  %v2771_v60 = vor.u32 %v3004_v10, %v2768_v21 }
 0x263   :  { %2216 = vst.msk [vmem:[%s5084_s2 + $0x8] sm:$0xff] %vm2214_vm1, %v2143_v3  ;;  %1950 = vmatmul.bf16.gmra.mxu3 %v2807_v25  ;;  %2018 = vmatmul.bf16.gmra.mxu0 %v2679_v58  ;;  %v2063_v18 = vadd.f32 %v2062_v4, %v1980_v43  ;;  %v2731_v25 = vor.u32 %v2999_v23, %v2730_v50 }
 0x264   :  { %2101 = vmatmul.bf16.gmra.mxu1 %v2683_v26 }
 0x265   :  { %2873 = vmatmul.msk.bf16.gmra.mxu2 %vm1255_vm0, %v2687_v47 }
 0x266   :  { %v4829_v42 = vpop.f32.mrf.mxu3 }
 0x268   :  { %v2145_v54 = vpop.f32.mrf.mxu2  ;;  %v1981_v27 = vpop.f32.mrf.mxu0 }
 0x269   :  { %v2146_v0 = vadd.f32 %v2145_v54, %v2063_v18  ;;  %v2064_v16 = vpop.f32.mrf.mxu1  ;;  %v1982_v5 = vadd.f32 %v1981_v27, %v1899_v31  ;;  %v936_v18 = vunpack.c.h.b16 %v4451_v29  ;;  %v2766_v54 = vld [vmem:[%s5083_s0 + $0x3e8] sm:$0xf]  ;;  %v3009_v31 = vld [vmem:[%s5083_s0 + $0x410] sm:$0xf0]  ;;  %v2774_v29 = vld [vmem:[%s5083_s0 + $0x3f0] sm:$0xf] }
 0x26a   :  { %v2767_v39 = vor.u32 %v3009_v31, %v2766_v54 }
 0x26b   :  { %2217 = vst.msk [vmem:[%s5084_s2 + $0x10] sm:$0xff] %vm2214_vm1, %v2146_v0  ;;  %v2065_v19 = vadd.f32 %v2064_v16, %v1982_v5  ;;  %v3010_v0 = vld [vmem:[%s5083_s0 + $0x418] sm:$0xf0]  ;;  %v1101_v36 = vpack.c.b16 %v936_v18, %v936_v18  ;;  %v2815_v18 = vor.u32 %v3015_v61, %v2812_v56 }
 0x26c   :  { %v2775_v50 = vor.u32 %v3010_v0, %v2774_v29 }
 0x26e   :  { %v4861_v40 = vpop.f32.mrf.mxu3 }
 0x270   :  { %v2147_v35 = vpop.f32.mrf.mxu2  ;;  %v1984_v1 = vpop.f32.mrf.mxu0 }
 0x271   :  { %v2148_v13 = vadd.f32 %v2147_v35, %v2065_v19  ;;  %v2067_v58 = vpop.f32.mrf.mxu1  ;;  %v1985_v8 = vadd.f32 %v1984_v1, %v1902_v59 }
 0x273   :  { %2218 = vst.msk [vmem:[%s5084_s2 + $0x18] sm:$0xff] %vm2214_vm1, %v2148_v13  ;;  %1955 = vmatmul.bf16.gmra.mxu3 %v2851_v63  ;;  %2023 = vmatmul.bf16.gmra.mxu0 %v2723_v52  ;;  %v2068_v3 = vadd.f32 %v2067_v58, %v1985_v8  ;;  %v2818_v58 = vld [vmem:[%s5083_s0 + $0x448] sm:$0xf]  ;;  %v3021_v8 = vld [vmem:[%s5083_s0 + $0x470] sm:$0xf0] }
 0x274   :  { %2106 = vmatmul.bf16.gmra.mxu1 %v2727_v57  ;;  %v2810_v57 = vld [vmem:[%s5083_s0 + $0x440] sm:$0xf]  ;;  %v2819_v54 = vor.u32 %v3021_v8, %v2818_v58  ;;  %v184_v58 = vld [vmem:[%s5083_s0 + $0x4f0] sm:$0xff] }
 0x275   :  { %2874 = vmatmul.msk.bf16.gmra.mxu2 %vm1255_vm0, %v2731_v25  ;;  %v3020_v25 = vld [vmem:[%s5083_s0 + $0x468] sm:$0xf0] }
 0x276   :  { %v4870_v9 = vpop.f32.mrf.mxu3 }
 0x278   :  { %v2150_v34 = vpop.f32.mrf.mxu2  ;;  %v1986_v47 = vpop.f32.mrf.mxu0 }
 0x279   :  { %v2151_v26 = vadd.f32 %v2150_v34, %v2068_v3  ;;  %v2069_v4 = vpop.f32.mrf.mxu1  ;;  %v1987_v43 = vadd.f32 %v1986_v47, %v1904_v12  ;;  %v1912_v47 = vadd.f32 %v4829_v42, %v4406_v30  ;;  %v1914_v30 = vadd.f32 %v4861_v40, %v4436_v6  ;;  %v3026_v6 = vld [vmem:[%s5083_s0 + $0x49c] sm:$0xf]  ;;  %v2856_v40 = vld [vmem:[%s5083_s0 + $0x4c4] sm:$0xf0] }
 0x27b   :  { %2219 = vst.msk [vmem:[%s5084_s2 + $0x20] sm:$0xff] %vm2214_vm1, %v2151_v26  ;;  %v2070_v27 = vadd.f32 %v2069_v4, %v1987_v43  ;;  %v2811_v26 = vor.u32 %v3020_v25, %v2810_v57 }
 0x27e   :  { %v4897_v16 = vpop.f32.mrf.mxu3 }
 0x280   :  { %v2152_v5 = vpop.f32.mrf.mxu2  ;;  %v1989_v53 = vpop.f32.mrf.mxu0 }
 0x281   :  { %v2153_v45 = vadd.f32 %v2152_v5, %v2070_v27  ;;  %v2072_v23 = vpop.f32.mrf.mxu1  ;;  %v1990_v19 = vadd.f32 %v1989_v53, %v1907_v20  ;;  %v3031_v20 = vld [vmem:[%s5083_s0 + $0x4c0] sm:$0xf0]  ;;  %v3032_v53 = vld [vmem:[%s5083_s0 + $0x4c8] sm:$0xf0] }
 0x283   :  { %2220 = vst.msk [vmem:[%s5084_s2 + $0x28] sm:$0xff] %vm2214_vm1, %v2153_v45  ;;  %1960 = vmatmul.bf16.gmra.mxu3 %v1101_v36  ;;  %2028 = vmatmul.bf16.gmra.mxu0 %v2767_v39  ;;  %v2073_v35 = vadd.f32 %v2072_v23, %v1990_v19  ;;  %v2854_v39 = vld [vmem:[%s5083_s0 + $0x498] sm:$0xf]  ;;  %v2862_v45 = vld [vmem:[%s5083_s0 + $0x4a0] sm:$0xf] }
 0x284   :  { %2111 = vmatmul.bf16.gmra.mxu1 %v2771_v60  ;;  %v2855_v19 = vor.u32 %v3031_v20, %v2854_v39 }
 0x285   :  { %2875 = vmatmul.msk.bf16.gmra.mxu2 %vm1255_vm0, %v2775_v50 }
 0x286   :  { %v4906_v63 = vpop.f32.mrf.mxu3 }
 0x288   :  { %v2155_v51 = vpop.f32.mrf.mxu2  ;;  %v1991_v59 = vpop.f32.mrf.mxu0 }
 0x289   :  { %v2156_v52 = vadd.f32 %v2155_v51, %v2073_v35  ;;  %v2074_v13 = vpop.f32.mrf.mxu1  ;;  %v1992_v1 = vadd.f32 %v1991_v59, %v1909_v62  ;;  %v1917_v35 = vadd.f32 %v4870_v9, %v4442_v22  ;;  %v2863_v59 = vor.u32 %v3032_v53, %v2862_v45 }
 0x28a   :  { %v1919_v22 = vadd.f32 %v4897_v16, %v4463_v7 }
 0x28b   :  { %2221 = vst.msk [vmem:[%s5084_s2 + $0x30] sm:$0xff] %vm2214_vm1, %v2156_v52  ;;  %v2075_v3 = vadd.f32 %v2074_v13, %v1992_v1  ;;  %v2859_v52 = vor.u32 %v3026_v6, %v2856_v40 }
 0x28e   :  { %v4932_v34 = vpop.f32.mrf.mxu3 }
 0x290   :  { %v2157_v12 = vpop.f32.mrf.mxu2  ;;  %v1994_v43 = vpop.f32.mrf.mxu0 }
 0x291   :  { %v2158_v4 = vadd.f32 %v2157_v12, %v2075_v3  ;;  %v2077_v31 = vpop.f32.mrf.mxu1  ;;  %v1995_v10 = vadd.f32 %v1994_v43, %v1912_v47  ;;  %v185_v3 = vld [vmem:[%s5083_s0 + $0x4f8] sm:$0xf]  ;;  %v938_v47 = vunpack.c.h.b16 %v184_v58 }
 0x292   :  { %v939_v7 = vunpack.c.l.b16 %v185_v3 }
 0x293   :  { %2222 = vst.msk [vmem:[%s5084_s2 + $0x38] sm:$0xff] %vm2214_vm1, %v2158_v4  ;;  %2033 = vmatmul.bf16.gmra.mxu0 %v2811_v26  ;;  %v2078_v21 = vadd.f32 %v2077_v31, %v1995_v10  ;;  %v937_v26 = vunpack.c.l.b16 %v184_v58 }
 0x294   :  { %2116 = vmatmul.bf16.gmra.mxu1 %v2815_v18 }
 0x295   :  { %2876 = vmatmul.msk.bf16.gmra.mxu2 %vm1255_vm0, %v2819_v54  ;;  %v1102_v18 = vpack.c.b16 %v937_v26, %v937_v26  ;;  %v1922_v54 = vadd.f32 %v4906_v63, %v4469_v33  ;;  %v1924_v33 = vadd.f32 %v4932_v34, %v4499_v17 }
 0x296   :  { %v4941_v29 = vpop.f32.mrf.mxu3 }
 0x298   :  { %v2160_v0 = vpop.f32.mrf.mxu2  ;;  %v1996_v27 = vpop.f32.mrf.mxu0 }
 0x299   :  { %v2161_v42 = vadd.f32 %v2160_v0, %v2078_v21  ;;  %v2079_v5 = vpop.f32.mrf.mxu1  ;;  %v1997_v36 = vadd.f32 %v1996_v27, %v1914_v30  ;;  %v1103_v21 = vpack.c.b16 %v938_v47, %v938_v47  ;;  %v1104_v0 = vpack.c.b16 %v939_v7, %v939_v7 }
 0x29b   :  { %2223 = vst.msk [vmem:[%s5084_s2 + $0x40] sm:$0xff] %vm2214_vm1, %v2161_v42  ;;  %v2080_v60 = vadd.f32 %v2079_v5, %v1997_v36 }
 0x29e   :  { %v4967_v50 = vpop.f32.mrf.mxu3 }
 0x2a0   :  { %v2162_v23 = vpop.f32.mrf.mxu2  ;;  %v1999_v62 = vpop.f32.mrf.mxu0 }
 0x2a1   :  { %v2163_v51 = vadd.f32 %v2162_v23, %v2080_v60  ;;  %v2082_v13 = vpop.f32.mrf.mxu1  ;;  %v2000_v1 = vadd.f32 %v1999_v62, %v1917_v35  ;;  %v1927_v60 = vadd.f32 %v4941_v29, %v4506_v15 }
 0x2a3   :  { %2224 = vst.msk [vmem:[%s5084_s2 + $0x48] sm:$0xff] %vm2214_vm1, %v2163_v51  ;;  %2038 = vmatmul.bf16.gmra.mxu0 %v2855_v19  ;;  %v2083_v57 = vadd.f32 %v2082_v13, %v2000_v1 }
 0x2a4   :  { %2121 = vmatmul.bf16.gmra.mxu1 %v2859_v52  ;;  %v1929_v52 = vadd.f32 %v4967_v50, %v4536_v46 }
 0x2a5   :  { %2877 = vmatmul.msk.bf16.gmra.mxu2 %vm1255_vm0, %v2863_v59 }
 0x2a6   :  { %v1931_v25 = vpop.f32.mrf.mxu3 }
 0x2a8   :  { %v2165_v61 = vpop.f32.mrf.mxu2  ;;  %v2001_v56 = vpop.f32.mrf.mxu0 }
 0x2a9   :  { %v2166_v9 = vadd.f32 %v2165_v61, %v2083_v57  ;;  %v2084_v8 = vpop.f32.mrf.mxu1  ;;  %v2002_v12 = vadd.f32 %v2001_v56, %v1919_v22  ;;  %v1932_v22 = vadd.f32 %v1931_v25, %v4543_v44 }
 0x2ab   :  { %2225 = vst.msk [vmem:[%s5084_s2 + $0x50] sm:$0xff] %vm2214_vm1, %v2166_v9  ;;  %v2085_v16 = vadd.f32 %v2084_v8, %v2002_v12 }
 0x2ae   :  { %v1933_v4 = vpop.f32.mrf.mxu3 }
 0x2af   :  { %v1934_v12 = vadd.f32 %v1933_v4, %v4573_v38 }
 0x2b0   :  { %v2167_v43 = vpop.f32.mrf.mxu2  ;;  %v2004_v10 = vpop.f32.mrf.mxu0 }
 0x2b1   :  { %v2168_v31 = vadd.f32 %v2167_v43, %v2085_v16  ;;  %v2087_v30 = vpop.f32.mrf.mxu1  ;;  %v2005_v42 = vadd.f32 %v2004_v10, %v1922_v54 }
 0x2b3   :  { %2226 = vst.msk [vmem:[%s5084_s2 + $0x58] sm:$0xff] %vm2214_vm1, %v2168_v31  ;;  %2043 = vmatmul.bf16.gmra.mxu0 %v1102_v18  ;;  %v2088_v27 = vadd.f32 %v2087_v30, %v2005_v42 }
 0x2b4   :  { %2126 = vmatmul.bf16.gmra.mxu1 %v1103_v21 }
 0x2b5   :  { %2878 = vmatmul.msk.bf16.gmra.mxu2 %vm1255_vm0, %v1104_v0 }
 0x2b6   :  { %v1936_v5 = vpop.f32.mrf.mxu3 }
 0x2b7   :  { %v1937_v18 = vadd.f32 %v1936_v5, %v4580_v14 }
 0x2b8   :  { %v2170_v36 = vpop.f32.mrf.mxu2  ;;  %v2006_v39 = vpop.f32.mrf.mxu0 }
 0x2b9   :  { %v2171_v63 = vadd.f32 %v2170_v36, %v2088_v27  ;;  %v2089_v20 = vpop.f32.mrf.mxu1  ;;  %v2007_v6 = vadd.f32 %v2006_v39, %v1924_v33 }
 0x2bb   :  { %2227 = vst.msk [vmem:[%s5084_s2 + $0x60] sm:$0xff] %vm2214_vm1, %v2171_v63  ;;  %v2090_v40 = vadd.f32 %v2089_v20, %v2007_v6 }
 0x2be   :  { %v1938_v45 = vpop.f32.mrf.mxu3 }
 0x2bf   :  { %v1939_v30 = vadd.f32 %v1938_v45, %v4610_v11 }
 0x2c0   :  { %v2172_v53 = vpop.f32.mrf.mxu2  ;;  %v2009_v19 = vpop.f32.mrf.mxu0 }
 0x2c1   :  { %v2173_v23 = vadd.f32 %v2172_v53, %v2090_v40  ;;  %v2092_v35 = vpop.f32.mrf.mxu1  ;;  %v2010_v17 = vadd.f32 %v2009_v19, %v1927_v60 }
 0x2c3   :  { %2228 = vst.msk [vmem:[%s5084_s2 + $0x68] sm:$0xff] %vm2214_vm1, %v2173_v23  ;;  %v2093_v34 = vadd.f32 %v2092_v35, %v2010_v17 }
 0x2c6   :  { %v1941_v51 = vpop.f32.mrf.mxu3 }
 0x2c7   :  { %v1942_v39 = vadd.f32 %v1941_v51, %v4617_v28 }
 0x2c8   :  { %v2175_v62 = vpop.f32.mrf.mxu2  ;;  %v2011_v13 = vpop.f32.mrf.mxu0 }
 0x2c9   :  { %v2176_v59 = vadd.f32 %v2175_v62, %v2093_v34  ;;  %v2094_v1 = vpop.f32.mrf.mxu1  ;;  %v2012_v15 = vadd.f32 %v2011_v13, %v1929_v52 }
 0x2cb   :  { %2229 = vst.msk [vmem:[%s5084_s2 + $0x70] sm:$0xff] %vm2214_vm1, %v2176_v59  ;;  %v2095_v29 = vadd.f32 %v2094_v1, %v2012_v15 }
 0x2ce   :  { %v1943_v57 = vpop.f32.mrf.mxu3 }
 0x2cf   :  { %v1944_v23 = vadd.f32 %v1943_v57, %v4647_v48 }
 0x2d0   :  { %v2177_v61 = vpop.f32.mrf.mxu2  ;;  %v2014_v56 = vpop.f32.mrf.mxu0 }
 0x2d1   :  { %v2178_v9 = vadd.f32 %v2177_v61, %v2095_v29  ;;  %v2097_v58 = vpop.f32.mrf.mxu1  ;;  %v2015_v46 = vadd.f32 %v2014_v56, %v1932_v22 }
 0x2d3   :  { %2230 = vst.msk [vmem:[%s5084_s2 + $0x78] sm:$0xff] %vm2214_vm1, %v2178_v9  ;;  %v2098_v50 = vadd.f32 %v2097_v58, %v2015_v46 }
 0x2d6   :  { %v1946_v8 = vpop.f32.mrf.mxu3 }
 0x2d7   :  { %v1947_v52 = vadd.f32 %v1946_v8, %v4654_v41 }
 0x2d8   :  { %v2180_v3 = vpop.f32.mrf.mxu2  ;;  %v2016_v47 = vpop.f32.mrf.mxu0 }
 0x2d9   :  { %v2181_v26 = vadd.f32 %v2180_v3, %v2098_v50  ;;  %v2099_v7 = vpop.f32.mrf.mxu1  ;;  %v2017_v44 = vadd.f32 %v2016_v47, %v1934_v12 }
 0x2db   :  { %2231 = vst.msk [vmem:[%s5084_s2 + $0x80] sm:$0xff] %vm2214_vm1, %v2181_v26  ;;  %v2100_v25 = vadd.f32 %v2099_v7, %v2017_v44 }
 0x2de   :  { %v1948_v16 = vpop.f32.mrf.mxu3 }
 0x2df   :  { %v1949_v61 = vadd.f32 %v1948_v16, %v4681_v2 }
 0x2e0   :  { %v2182_v43 = vpop.f32.mrf.mxu2  ;;  %v2019_v31 = vpop.f32.mrf.mxu0 }
 0x2e1   :  { %v2183_v54 = vadd.f32 %v2182_v43, %v2100_v25  ;;  %v2102_v10 = vpop.f32.mrf.mxu1  ;;  %v2020_v38 = vadd.f32 %v2019_v31, %v1937_v18 }
 0x2e3   :  { %2232 = vst.msk [vmem:[%s5084_s2 + $0x88] sm:$0xff] %vm2214_vm1, %v2183_v54  ;;  %v2103_v4 = vadd.f32 %v2102_v10, %v2020_v38 }
 0x2e6   :  { %v1951_v21 = vpop.f32.mrf.mxu3 }
 0x2e7   :  { %v1952_v8 = vadd.f32 %v1951_v21, %v4687_v37 }
 0x2e8   :  { %v2185_v0 = vpop.f32.mrf.mxu2  ;;  %v2021_v27 = vpop.f32.mrf.mxu0 }
 0x2e9   :  { %v2186_v42 = vadd.f32 %v2185_v0, %v2103_v4  ;;  %v2104_v36 = vpop.f32.mrf.mxu1  ;;  %v2022_v14 = vadd.f32 %v2021_v27, %v1939_v30 }
 0x2eb   :  { %2233 = vst.msk [vmem:[%s5084_s2 + $0x90] sm:$0xff] %vm2214_vm1, %v2186_v42  ;;  %v2105_v5 = vadd.f32 %v2104_v36, %v2022_v14 }
 0x2ee   :  { %v1953_v33 = vpop.f32.mrf.mxu3 }
 0x2ef   :  { %v1954_v44 = vadd.f32 %v1953_v33, %v4716_v55 }
 0x2f0   :  { %v2187_v63 = vpop.f32.mrf.mxu2  ;;  %v2024_v6 = vpop.f32.mrf.mxu0 }
 0x2f1   :  { %v2188_v20 = vadd.f32 %v2187_v63, %v2105_v5  ;;  %v2107_v40 = vpop.f32.mrf.mxu1  ;;  %v2025_v11 = vadd.f32 %v2024_v6, %v1942_v39 }
 0x2f3   :  { %2234 = vst.msk [vmem:[%s5084_s2 + $0x98] sm:$0xff] %vm2214_vm1, %v2188_v20  ;;  %v2108_v45 = vadd.f32 %v2107_v40, %v2025_v11 }
 0x2f6   :  { %v1956_v53 = vpop.f32.mrf.mxu3 }
 0x2f7   :  { %v1957_v31 = vadd.f32 %v1956_v53, %v4722_v49 }
 0x2f8   :  { %v2190_v60 = vpop.f32.mrf.mxu2  ;;  %v2026_v35 = vpop.f32.mrf.mxu0 }
 0x2f9   :  { %v2191_v19 = vadd.f32 %v2190_v60, %v2108_v45  ;;  %v2109_v17 = vpop.f32.mrf.mxu1  ;;  %v2027_v28 = vadd.f32 %v2026_v35, %v1944_v23 }
 0x2fb   :  { %2235 = vst.msk [vmem:[%s5084_s2 + $0xa0] sm:$0xff] %vm2214_vm1, %v2191_v19  ;;  %v2110_v34 = vadd.f32 %v2109_v17, %v2027_v28 }
 0x2fe   :  { %v1958_v51 = vpop.f32.mrf.mxu3 }
 0x2ff   :  { %v1959_v30 = vadd.f32 %v1958_v51, %v4751_v32 }
 0x300   :  { %v2192_v62 = vpop.f32.mrf.mxu2  ;;  %v2029_v13 = vpop.f32.mrf.mxu0 }
 0x301   :  { %v2193_v59 = vadd.f32 %v2192_v62, %v2110_v34  ;;  %v2112_v1 = vpop.f32.mrf.mxu1  ;;  %v2030_v48 = vadd.f32 %v2029_v13, %v1947_v52 }
 0x303   :  { %2236 = vst.msk [vmem:[%s5084_s2 + $0xa8] sm:$0xff] %vm2214_vm1, %v2193_v59  ;;  %v2113_v15 = vadd.f32 %v2112_v1, %v2030_v48 }
 0x306   :  { %v1961_v29 = vpop.f32.mrf.mxu3 }
 0x307   :  { %v1962_v33 = vadd.f32 %v1961_v29, %v4757_v24 }
 0x308   :  { %v2195_v57 = vpop.f32.mrf.mxu2  ;;  %v2031_v9 = vpop.f32.mrf.mxu0 }
 0x309   :  { %v2196_v22 = vadd.f32 %v2195_v57, %v2113_v15  ;;  %v2114_v56 = vpop.f32.mrf.mxu1  ;;  %v2032_v41 = vadd.f32 %v2031_v9, %v1949_v61 }
 0x30b   :  { %2237 = vst.msk [vmem:[%s5084_s2 + $0xb0] sm:$0xff] %vm2214_vm1, %v2196_v22  ;;  %v2115_v58 = vadd.f32 %v2114_v56, %v2032_v41 }
 0x30e   :  { %v1963_v46 = vpop.f32.mrf.mxu3 }
 0x310   :  { %v2197_v50 = vpop.f32.mrf.mxu2  ;;  %v2034_v12 = vpop.f32.mrf.mxu0 }
 0x311   :  { %v2198_v3 = vadd.f32 %v2197_v50, %v2115_v58  ;;  %v2117_v26 = vpop.f32.mrf.mxu1  ;;  %v2035_v2 = vadd.f32 %v2034_v12, %v1952_v8 }
 0x313   :  { %2238 = vst.msk [vmem:[%s5084_s2 + $0xb8] sm:$0xff] %vm2214_vm1, %v2198_v3  ;;  %v2118_v47 = vadd.f32 %v2117_v26, %v2035_v2 }
 0x318   :  { %v2200_v7 = vpop.f32.mrf.mxu2  ;;  %v2036_v16 = vpop.f32.mrf.mxu0 }
 0x319   :  { %v2201_v25 = vadd.f32 %v2200_v7, %v2118_v47  ;;  %v2119_v43 = vpop.f32.mrf.mxu1  ;;  %v2037_v37 = vadd.f32 %v2036_v16, %v1954_v44 }
 0x31b   :  { %2239 = vst.msk [vmem:[%s5084_s2 + $0xc0] sm:$0xff] %vm2214_vm1, %v2201_v25  ;;  %v2120_v18 = vadd.f32 %v2119_v43, %v2037_v37 }
 0x320   :  { %v2202_v54 = vpop.f32.mrf.mxu2  ;;  %v2039_v38 = vpop.f32.mrf.mxu0 }
 0x321   :  { %v2203_v10 = vadd.f32 %v2202_v54, %v2120_v18  ;;  %v2122_v4 = vpop.f32.mrf.mxu1  ;;  %v2040_v55 = vadd.f32 %v2039_v38, %v1957_v31 }
 0x323   :  { %2240 = vst.msk [vmem:[%s5084_s2 + $0xc8] sm:$0xff] %vm2214_vm1, %v2203_v10  ;;  %v2123_v21 = vadd.f32 %v2122_v4, %v2040_v55 }
 0x328   :  { %v2205_v0 = vpop.f32.mrf.mxu2  ;;  %v2041_v27 = vpop.f32.mrf.mxu0 }
 0x329   :  { %v2206_v42 = vadd.f32 %v2205_v0, %v2123_v21  ;;  %v2124_v36 = vpop.f32.mrf.mxu1  ;;  %v2042_v49 = vadd.f32 %v2041_v27, %v1959_v30 }
 0x32b   :  { %2241 = vst.msk [vmem:[%s5084_s2 + $0xd0] sm:$0xff] %vm2214_vm1, %v2206_v42  ;;  %v2125_v14 = vadd.f32 %v2124_v36, %v2042_v49 }
 0x330   :  { %v2207_v5 = vpop.f32.mrf.mxu2  ;;  %v2044_v39 = vpop.f32.mrf.mxu0 }
 0x331   :  { %v2208_v63 = vadd.f32 %v2207_v5, %v2125_v14  ;;  %v2127_v20 = vpop.f32.mrf.mxu1  ;;  %v2045_v32 = vadd.f32 %v2044_v39, %v1962_v33 }
 0x333   :  { %2242 = vst.msk [vmem:[%s5084_s2 + $0xd8] sm:$0xff] %vm2214_vm1, %v2208_v63  ;;  %v2128_v6 = vadd.f32 %v2127_v20, %v2045_v32 }
 0x338   :  { %v2210_v40 = vpop.f32.mrf.mxu2  ;;  %v2046_v45 = vpop.f32.mrf.mxu0 }
 0x339   :  { %v2211_v11 = vadd.f32 %v2210_v40, %v2128_v6  ;;  %v2129_v53 = vpop.f32.mrf.mxu1 }
 0x33b   :  { %2243 = vst.msk [vmem:[%s5084_s2 + $0xe0] sm:$0xff] %vm2214_vm1, %v2211_v11 }
 0x340   :  { %v2212_v24 = vpop.f32.mrf.mxu2 }

</bundles_post_ra>
